<compile_context>
chip_gen: v7x
topology: tpu7x:2x2x1
jax: 0.10.0
libtpu: 0.0.40
codegen_flags: <defaults>
</compile_context>

<pallas_src>
import functools

import jax
import jax.numpy as jnp
from jax.experimental import pallas as pl
from jax.experimental.pallas import tpu as pltpu


# ---------------------------------------------------------------------------
# Model config (mirrors USADConfig defaults)
# ---------------------------------------------------------------------------
HIDDEN_SIZES = (25, 10, 5)
LATENT_SIZE = 5
N_LAYERS = 8          # 4 encoder + 4 fused-decoder layers
LANE = 128


def _round_up(v, m):
    return (v + m - 1) // m * m


def _cdiv(a, b):
    return (a + b - 1) // b


def _sublane_tile(dtype):
    # rows per (sublane, lane) vreg tile: f32 -> 8, bf16 -> 16, int8 -> 32
    return 8 * (4 // jnp.dtype(dtype).itemsize)


# ---------------------------------------------------------------------------
# Fused-layer geometry (8 layers: 4 encoder + 4 fused-decoder)
# ---------------------------------------------------------------------------
def _fused_layer_shapes(x_dim):
    """Raw (k, n) of the 8 fused layers."""
    enc = [x_dim, *HIDDEN_SIZES, LATENT_SIZE]
    dec = [LATENT_SIZE, *HIDDEN_SIZES[::-1], x_dim]
    shapes = [(enc[i], enc[i + 1]) for i in range(4)]
    shapes.append((dec[0], 2 * dec[1]))                    # shared z -> column concat
    for i in range(1, 4):
        shapes.append((2 * dec[i], 2 * dec[i + 1]))        # block-diagonal
    return shapes


def _param_layout(x_dim):
    """(row_off, Kp, Np) of each fused layer inside the packed weight slab.

    Every block is padded to a (128*k, 128*m) region so all in-kernel slices
    are (8,128)-tile aligned.  Kp of layer i+1 always equals Np of layer i,
    so activations stay at a consistent 128-multiple width through the chain.
    """
    shapes = _fused_layer_shapes(x_dim)
    layout, off = [], 0
    for k, n in shapes:
        kp, np_ = _round_up(k, LANE), _round_up(n, LANE)
        layout.append((off, kp, np_))
        off += kp
    n_cols = max(np_ for _, _, np_ in layout)
    return tuple(layout), off, n_cols


# ---------------------------------------------------------------------------
# Kernel
# ---------------------------------------------------------------------------
def usad_kernel(x_ref, w_ref, b_ref, out_ref, *, layout, sub_b, p_in, p_dec):
    compute_dtype = w_ref.dtype

    def layer(h, idx, relu):
        off, kp, np_ = layout[idx]
        w = w_ref[off:off + kp, 0:np_]                    # tile-aligned slice
        y = jnp.dot(h.astype(compute_dtype), w,
                    preferred_element_type=jnp.float32)   # f32 accumulation
        y = y + b_ref[idx * sub_b:idx * sub_b + 1, 0:np_].astype(jnp.float32)
        if relu:
            y = jnp.maximum(y, 0.0)
        return y

    def encode(h):
        for i in range(3):
            h = layer(h, i, relu=True)
        return layer(h, 3, relu=False)

    def decode_fused(z):                                  # decoder_g || decoder_d
        h = z
        for i in range(4, 7):
            h = layer(h, i, relu=True)
        return layer(h, 7, relu=False)

    # Pass 1: x -> z -> [w_g | w_d | 0-pad]   (p_dec lanes)
    gd1 = decode_fused(encode(x_ref[...]))
    # Pass 2: re-encode w_g.  The 128-aligned slice keeps the first p_in lanes;
    # any w_d values in lanes >= x_dim multiply zero-padded weight rows, so
    # this equals encoding w_g alone.
    gd2 = decode_fused(encode(gd1[:, 0:p_in]))
    # Two unmasked, lane-dense stores into 128-aligned regions of the slab.
    out_ref[:, 0:p_dec] = gd1.astype(out_ref.dtype)
    out_ref[:, p_dec:2 * p_dec] = gd2.astype(out_ref.dtype)


# ---------------------------------------------------------------------------
# Parameter construction (deterministic, PyTorch-style uniform init)
# ---------------------------------------------------------------------------
def _init_linear(key, in_features, out_features):
    kw, kb = jax.random.split(key)
    bound = 1.0 / jnp.sqrt(jnp.float32(in_features))
    w = jax.random.uniform(kw, (in_features, out_features), jnp.float32,
                           -bound, bound)
    b = jax.random.uniform(kb, (1, out_features), jnp.float32, -bound, bound)
    return w, b


def make_usad_params(key, x_dim):
    """24 raw arrays (w, b per layer): encoder, decoder_g, decoder_d."""
    keys = jax.random.split(key, 12)
    params = []
    enc_dims = [x_dim, *HIDDEN_SIZES, LATENT_SIZE]
    for i in range(4):
        w, b = _init_linear(keys[i], enc_dims[i], enc_dims[i + 1])
        params += [w, b]
    dec_dims = [LATENT_SIZE, *HIDDEN_SIZES[::-1], x_dim]
    for d in range(2):  # decoder_g, decoder_d
        for i in range(4):
            w, b = _init_linear(keys[4 + 4 * d + i], dec_dims[i], dec_dims[i + 1])
            params += [w, b]
    return params


def pack_usad_params(params, x_dim, dtype=jnp.float32):
    """Pack + fuse the raw params into tile-aligned (wbuf, bbuf) slabs."""
    enc, dec_g, dec_d = params[0:8], params[8:16], params[16:24]

    fused_w, fused_b = [], []
    for i in range(4):                                     # encoder layers
        fused_w.append(enc[2 * i])
        fused_b.append(enc[2 * i + 1].reshape(-1))
    # decoder layer 0: same input z for both -> column concat
    fused_w.append(jnp.concatenate([dec_g[0], dec_d[0]], axis=1))
    fused_b.append(jnp.concatenate([dec_g[1].reshape(-1),
                                    dec_d[1].reshape(-1)]))
    # decoder layers 1..3: independent paths -> block diagonal
    for i in range(1, 4):
        gw, gb = dec_g[2 * i], dec_g[2 * i + 1].reshape(-1)
        dw, db = dec_d[2 * i], dec_d[2 * i + 1].reshape(-1)
        k, n = gw.shape
        blk = jnp.zeros((2 * k, 2 * n), jnp.float32)
        blk = blk.at[:k, :n].set(gw).at[k:, n:].set(dw)
        fused_w.append(blk)
        fused_b.append(jnp.concatenate([gb, db]))

    layout, n_rows, n_cols = _param_layout(x_dim)
    sub_b = _sublane_tile(dtype)
    wbuf = jnp.zeros((n_rows, n_cols), dtype)              # zero pad everywhere
    bbuf = jnp.zeros((N_LAYERS * sub_b, n_cols), dtype)
    for i, ((off, _, _), w, b) in enumerate(zip(layout, fused_w, fused_b)):
        k, n = w.shape
        wbuf = wbuf.at[off:off + k, 0:n].set(w.astype(dtype))
        brow = jnp.broadcast_to(b.astype(dtype)[None, :], (sub_b, n))
        bbuf = bbuf.at[i * sub_b:(i + 1) * sub_b, 0:n].set(brow)
    return wbuf, bbuf


# ---------------------------------------------------------------------------
# Wrapper
# ---------------------------------------------------------------------------
@functools.partial(jax.jit, static_argnames=("tm",))
def usad_forward(x, wbuf, bbuf, *, tm=None):
    batch, x_dim = x.shape
    layout, n_rows, n_cols = _param_layout(x_dim)
    sub_b = bbuf.shape[0] // N_LAYERS
    assert wbuf.shape == (n_rows, n_cols)
    assert bbuf.shape == (N_LAYERS * sub_b, n_cols)

    p_in = _round_up(x_dim, LANE)            # lane-padded input width
    p_dec = _round_up(2 * x_dim, LANE)       # fused-decoder output width
    out_cols = 2 * p_dec                     # [gd pass1 | gd pass2]

    itemsize = jnp.dtype(x.dtype).itemsize
    padded8 = _round_up(batch, 8)

    # tm: >=2 grid steps so "parallel" can split the batch across v7x's two
    # TensorCores; tm divides the padded batch as evenly as possible (no ~2x
    # pad waste); capped by a VMEM budget (double-buffered x + out blocks).
    vmem_budget = 20 * 1024 * 1024
    tm_cap = max(8, (vmem_budget // (2 * (p_in + out_cols) * itemsize)) // 8 * 8)
    if tm is None:
        target = min(1024, tm_cap)
        min_steps = 2 if padded8 >= 16 else 1
        n_steps = max(min_steps, _cdiv(padded8, target))
        tm = _round_up(_cdiv(padded8, n_steps), 8)
    else:
        tm = max(8, _round_up(tm, 8))
        n_steps = _cdiv(padded8, tm)
    padded_batch = n_steps * tm

    xp = jnp.pad(x, ((0, padded_batch - batch), (0, p_in - x_dim)))

    kernel = functools.partial(usad_kernel, layout=layout, sub_b=sub_b,
                               p_in=p_in, p_dec=p_dec)

    out = pl.pallas_call(
        kernel,
        out_shape=jax.ShapeDtypeStruct((padded_batch, out_cols), x.dtype),
        grid=(n_steps,),
        in_specs=[
            pl.BlockSpec((tm, p_in), lambda i: (i, 0)),
            pl.BlockSpec((n_rows, n_cols), lambda i: (0, 0)),            # resident
            pl.BlockSpec((N_LAYERS * sub_b, n_cols), lambda i: (0, 0)),  # resident
        ],
        out_specs=pl.BlockSpec((tm, out_cols), lambda i: (i, 0)),
        compiler_params=pltpu.CompilerParams(
            dimension_semantics=("parallel",),
            vmem_limit_bytes=32 * 1024 * 1024,
        ),
    )(xp, wbuf, bbuf)

    w_g = out[:batch, 0:x_dim]
    w_d = out[:batch, x_dim:2 * x_dim]
    w_g_d = out[:batch, p_dec + x_dim:p_dec + 2 * x_dim]
    return w_g, w_d, w_g_d


# ---------------------------------------------------------------------------
# Pure-JAX reference (uses the raw, un-fused params)
# ---------------------------------------------------------------------------
def usad_reference(x, params):
    def mlp4(h, p):
        for i in range(4):
            w, b = p[2 * i], p[2 * i + 1]
            h = h @ w + b
            if i < 3:
                h = jnp.maximum(h, 0.0)
        return h

    enc, dec_g, dec_d = params[0:8], params[8:16], params[16:24]
    z = mlp4(x, enc)
    w_g = mlp4(z, dec_g)
    w_d = mlp4(z, dec_d)
    w_g_d = mlp4(mlp4(w_g, enc), dec_d)
    return w_g, w_d, w_g_d


if __name__ == "__main__":
    key = jax.random.PRNGKey(0)
    k_x, k_p = jax.random.split(key)

    BATCH, X_DIM = 250, 32           # non-multiple batch exercises pad/slice path
    x = jax.random.normal(k_x, (BATCH, X_DIM), jnp.float32)
    raw_params = make_usad_params(k_p, X_DIM)
    r_g, r_d, r_g_d = usad_reference(x, raw_params)

    # f32 path, default tm heuristic (padded8=256 -> grid=(2,), tm=128).
    wbuf, bbuf = pack_usad_params(raw_params, X_DIM, dtype=jnp.float32)
    w_g, w_d, w_g_d = usad_forward(x, wbuf, bbuf)
    jax.block_until_ready((w_g, w_d, w_g_d))
    assert w_g.shape == (BATCH, X_DIM)
    assert w_d.shape == (BATCH, X_DIM)
    assert w_g_d.shape == (BATCH, X_DIM)
    assert jnp.allclose(w_g, r_g, atol=2e-4, rtol=2e-4)
    assert jnp.allclose(w_d, r_d, atol=2e-4, rtol=2e-4)
    assert jnp.allclose(w_g_d, r_g_d, atol=2e-4, rtol=2e-4)

    # Explicit small tile -> 4-step grid + batch padding path.
    w_g2, w_d2, w_g_d2 = usad_forward(x, wbuf, bbuf, tm=64)
    jax.block_until_ready((w_g2, w_d2, w_g_d2))
    assert jnp.allclose(w_g2, r_g, atol=2e-4, rtol=2e-4)
    assert jnp.allclose(w_g_d2, r_g_d, atol=2e-4, rtol=2e-4)

    # bf16 operand path (MXU/HBM win on v6e/v7x): f32 accumulation inside,
    # accuracy-checked against the f32 reference with a loose tolerance.
    xb = x.astype(jnp.bfloat16)
    wbuf16, bbuf16 = pack_usad_params(raw_params, X_DIM, dtype=jnp.bfloat16)
    b_g, b_d, b_g_d = usad_forward(xb, wbuf16, bbuf16)
    jax.block_until_ready((b_g, b_d, b_g_d))
    assert b_g.dtype == jnp.bfloat16 and b_g.shape == (BATCH, X_DIM)
    assert jnp.allclose(b_g.astype(jnp.float32), r_g, atol=6e-2, rtol=6e-2)
    assert jnp.allclose(b_d.astype(jnp.float32), r_d, atol=6e-2, rtol=6e-2)
    assert jnp.allclose(b_g_d.astype(jnp.float32), r_g_d, atol=6e-2, rtol=6e-2)

    print("KERNEL_OK")
</pallas_src>

<mosaic_0001>
module attributes {stable_mosaic.version = 11 : i64} {
  func.func @usad_kernel(%arg0: i32, %arg1: memref<128x128xf32, #tpu.memory_space<vmem>>, %arg2: memref<1024x128xf32, #tpu.memory_space<vmem>>, %arg3: memref<64x128xf32, #tpu.memory_space<vmem>>, %arg4: memref<128x256xf32, #tpu.memory_space<vmem>>) attributes {dimension_semantics = [#tpu.dimension_semantics<parallel>], iteration_bounds = array<i64: 2>, scalar_prefetch = 0 : i64, scratch_operands = 0 : i64, tpu.core_type = #tpu.core_type<tc>, window_params = [{transform_indices = @transform_0, window_bounds = array<i64: 128, 128>}, {pipeline_mode = #tpu.pipeline_mode<synchronous>, transform_indices = @transform_1, window_bounds = array<i64: 1024, 128>}, {pipeline_mode = #tpu.pipeline_mode<synchronous>, transform_indices = @transform_2, window_bounds = array<i64: 64, 128>}, {transform_indices = @transform_3, window_bounds = array<i64: 128, 256>}]} {
    %c0 = arith.constant 0 : index
    %c0_0 = arith.constant 0 : index
    %0 = vector.load %arg1[%c0, %c0_0] : memref<128x128xf32, #tpu.memory_space<vmem>>, vector<128x128xf32>
    %c0_1 = arith.constant 0 : index
    %c0_2 = arith.constant 0 : index
    %1 = vector.load %arg2[%c0_1, %c0_2] : memref<1024x128xf32, #tpu.memory_space<vmem>>, vector<128x128xf32>
    %cst = arith.constant dense<0.000000e+00> : vector<128x128xf32>
    %2 = tpu.matmul %0, %1, %cst {dimension_numbers = #tpu.dot_dimension_numbers<[1], [0], [0], [1], [0, 0, 1, 1], [], []>} : vector<128x128xf32>, vector<128x128xf32>, vector<128x128xf32> -> vector<128x128xf32>
    %c0_3 = arith.constant 0 : index
    %c0_4 = arith.constant 0 : index
    %3 = vector.load %arg3[%c0_3, %c0_4] : memref<64x128xf32, #tpu.memory_space<vmem>>, vector<1x128xf32>
    %4 = vector.broadcast %3 : vector<1x128xf32> to vector<128x128xf32>
    %5 = arith.addf %2, %4 : vector<128x128xf32>
    %cst_5 = arith.constant 0.000000e+00 : f32
    %6 = vector.broadcast %cst_5 : f32 to vector<128x128xf32>
    %7 = arith.maximumf %5, %6 : vector<128x128xf32>
    %c128 = arith.constant 128 : index
    %c0_6 = arith.constant 0 : index
    %8 = vector.load %arg2[%c128, %c0_6] : memref<1024x128xf32, #tpu.memory_space<vmem>>, vector<128x128xf32>
    %cst_7 = arith.constant dense<0.000000e+00> : vector<128x128xf32>
    %9 = tpu.matmul %7, %8, %cst_7 {dimension_numbers = #tpu.dot_dimension_numbers<[1], [0], [0], [1], [0, 0, 1, 1], [], []>} : vector<128x128xf32>, vector<128x128xf32>, vector<128x128xf32> -> vector<128x128xf32>
    %c8 = arith.constant 8 : index
    %c0_8 = arith.constant 0 : index
    %10 = vector.load %arg3[%c8, %c0_8] : memref<64x128xf32, #tpu.memory_space<vmem>>, vector<1x128xf32>
    %11 = vector.broadcast %10 : vector<1x128xf32> to vector<128x128xf32>
    %12 = arith.addf %9, %11 : vector<128x128xf32>
    %cst_9 = arith.constant 0.000000e+00 : f32
    %13 = vector.broadcast %cst_9 : f32 to vector<128x128xf32>
    %14 = arith.maximumf %12, %13 : vector<128x128xf32>
    %c256 = arith.constant 256 : index
    %c0_10 = arith.constant 0 : index
    %15 = vector.load %arg2[%c256, %c0_10] : memref<1024x128xf32, #tpu.memory_space<vmem>>, vector<128x128xf32>
    %cst_11 = arith.constant dense<0.000000e+00> : vector<128x128xf32>
    %16 = tpu.matmul %14, %15, %cst_11 {dimension_numbers = #tpu.dot_dimension_numbers<[1], [0], [0], [1], [0, 0, 1, 1], [], []>} : vector<128x128xf32>, vector<128x128xf32>, vector<128x128xf32> -> vector<128x128xf32>
    %c16 = arith.constant 16 : index
    %c0_12 = arith.constant 0 : index
    %17 = vector.load %arg3[%c16, %c0_12] : memref<64x128xf32, #tpu.memory_space<vmem>>, vector<1x128xf32>
    %18 = vector.broadcast %17 : vector<1x128xf32> to vector<128x128xf32>
    %19 = arith.addf %16, %18 : vector<128x128xf32>
    %cst_13 = arith.constant 0.000000e+00 : f32
    %20 = vector.broadcast %cst_13 : f32 to vector<128x128xf32>
    %21 = arith.maximumf %19, %20 : vector<128x128xf32>
    %c384 = arith.constant 384 : index
    %c0_14 = arith.constant 0 : index
    %22 = vector.load %arg2[%c384, %c0_14] : memref<1024x128xf32, #tpu.memory_space<vmem>>, vector<128x128xf32>
    %cst_15 = arith.constant dense<0.000000e+00> : vector<128x128xf32>
    %23 = tpu.matmul %21, %22, %cst_15 {dimension_numbers = #tpu.dot_dimension_numbers<[1], [0], [0], [1], [0, 0, 1, 1], [], []>} : vector<128x128xf32>, vector<128x128xf32>, vector<128x128xf32> -> vector<128x128xf32>
    %c24 = arith.constant 24 : index
    %c0_16 = arith.constant 0 : index
    %24 = vector.load %arg3[%c24, %c0_16] : memref<64x128xf32, #tpu.memory_space<vmem>>, vector<1x128xf32>
    %25 = vector.broadcast %24 : vector<1x128xf32> to vector<128x128xf32>
    %26 = arith.addf %23, %25 : vector<128x128xf32>
    %c512 = arith.constant 512 : index
    %c0_17 = arith.constant 0 : index
    %27 = vector.load %arg2[%c512, %c0_17] : memref<1024x128xf32, #tpu.memory_space<vmem>>, vector<128x128xf32>
    %cst_18 = arith.constant dense<0.000000e+00> : vector<128x128xf32>
    %28 = tpu.matmul %26, %27, %cst_18 {dimension_numbers = #tpu.dot_dimension_numbers<[1], [0], [0], [1], [0, 0, 1, 1], [], []>} : vector<128x128xf32>, vector<128x128xf32>, vector<128x128xf32> -> vector<128x128xf32>
    %c32 = arith.constant 32 : index
    %c0_19 = arith.constant 0 : index
    %29 = vector.load %arg3[%c32, %c0_19] : memref<64x128xf32, #tpu.memory_space<vmem>>, vector<1x128xf32>
    %30 = vector.broadcast %29 : vector<1x128xf32> to vector<128x128xf32>
    %31 = arith.addf %28, %30 : vector<128x128xf32>
    %cst_20 = arith.constant 0.000000e+00 : f32
    %32 = vector.broadcast %cst_20 : f32 to vector<128x128xf32>
    %33 = arith.maximumf %31, %32 : vector<128x128xf32>
    %c640 = arith.constant 640 : index
    %c0_21 = arith.constant 0 : index
    %34 = vector.load %arg2[%c640, %c0_21] : memref<1024x128xf32, #tpu.memory_space<vmem>>, vector<128x128xf32>
    %cst_22 = arith.constant dense<0.000000e+00> : vector<128x128xf32>
    %35 = tpu.matmul %33, %34, %cst_22 {dimension_numbers = #tpu.dot_dimension_numbers<[1], [0], [0], [1], [0, 0, 1, 1], [], []>} : vector<128x128xf32>, vector<128x128xf32>, vector<128x128xf32> -> vector<128x128xf32>
    %c40 = arith.constant 40 : index
    %c0_23 = arith.constant 0 : index
    %36 = vector.load %arg3[%c40, %c0_23] : memref<64x128xf32, #tpu.memory_space<vmem>>, vector<1x128xf32>
    %37 = vector.broadcast %36 : vector<1x128xf32> to vector<128x128xf32>
    %38 = arith.addf %35, %37 : vector<128x128xf32>
    %cst_24 = arith.constant 0.000000e+00 : f32
    %39 = vector.broadcast %cst_24 : f32 to vector<128x128xf32>
    %40 = arith.maximumf %38, %39 : vector<128x128xf32>
    %c768 = arith.constant 768 : index
    %c0_25 = arith.constant 0 : index
    %41 = vector.load %arg2[%c768, %c0_25] : memref<1024x128xf32, #tpu.memory_space<vmem>>, vector<128x128xf32>
    %cst_26 = arith.constant dense<0.000000e+00> : vector<128x128xf32>
    %42 = tpu.matmul %40, %41, %cst_26 {dimension_numbers = #tpu.dot_dimension_numbers<[1], [0], [0], [1], [0, 0, 1, 1], [], []>} : vector<128x128xf32>, vector<128x128xf32>, vector<128x128xf32> -> vector<128x128xf32>
    %c48 = arith.constant 48 : index
    %c0_27 = arith.constant 0 : index
    %43 = vector.load %arg3[%c48, %c0_27] : memref<64x128xf32, #tpu.memory_space<vmem>>, vector<1x128xf32>
    %44 = vector.broadcast %43 : vector<1x128xf32> to vector<128x128xf32>
    %45 = arith.addf %42, %44 : vector<128x128xf32>
    %cst_28 = arith.constant 0.000000e+00 : f32
    %46 = vector.broadcast %cst_28 : f32 to vector<128x128xf32>
    %47 = arith.maximumf %45, %46 : vector<128x128xf32>
    %c896 = arith.constant 896 : index
    %c0_29 = arith.constant 0 : index
    %48 = vector.load %arg2[%c896, %c0_29] : memref<1024x128xf32, #tpu.memory_space<vmem>>, vector<128x128xf32>
    %cst_30 = arith.constant dense<0.000000e+00> : vector<128x128xf32>
    %49 = tpu.matmul %47, %48, %cst_30 {dimension_numbers = #tpu.dot_dimension_numbers<[1], [0], [0], [1], [0, 0, 1, 1], [], []>} : vector<128x128xf32>, vector<128x128xf32>, vector<128x128xf32> -> vector<128x128xf32>
    %c56 = arith.constant 56 : index
    %c0_31 = arith.constant 0 : index
    %50 = vector.load %arg3[%c56, %c0_31] : memref<64x128xf32, #tpu.memory_space<vmem>>, vector<1x128xf32>
    %51 = vector.broadcast %50 : vector<1x128xf32> to vector<128x128xf32>
    %52 = arith.addf %49, %51 : vector<128x128xf32>
    %c0_32 = arith.constant 0 : index
    %c0_33 = arith.constant 0 : index
    %53 = vector.load %arg2[%c0_32, %c0_33] : memref<1024x128xf32, #tpu.memory_space<vmem>>, vector<128x128xf32>
    %cst_34 = arith.constant dense<0.000000e+00> : vector<128x128xf32>
    %54 = tpu.matmul %52, %53, %cst_34 {dimension_numbers = #tpu.dot_dimension_numbers<[1], [0], [0], [1], [0, 0, 1, 1], [], []>} : vector<128x128xf32>, vector<128x128xf32>, vector<128x128xf32> -> vector<128x128xf32>
    %c0_35 = arith.constant 0 : index
    %c0_36 = arith.constant 0 : index
    %55 = vector.load %arg3[%c0_35, %c0_36] : memref<64x128xf32, #tpu.memory_space<vmem>>, vector<1x128xf32>
    %56 = vector.broadcast %55 : vector<1x128xf32> to vector<128x128xf32>
    %57 = arith.addf %54, %56 : vector<128x128xf32>
    %cst_37 = arith.constant 0.000000e+00 : f32
    %58 = vector.broadcast %cst_37 : f32 to vector<128x128xf32>
    %59 = arith.maximumf %57, %58 : vector<128x128xf32>
    %c128_38 = arith.constant 128 : index
    %c0_39 = arith.constant 0 : index
    %60 = vector.load %arg2[%c128_38, %c0_39] : memref<1024x128xf32, #tpu.memory_space<vmem>>, vector<128x128xf32>
    %cst_40 = arith.constant dense<0.000000e+00> : vector<128x128xf32>
    %61 = tpu.matmul %59, %60, %cst_40 {dimension_numbers = #tpu.dot_dimension_numbers<[1], [0], [0], [1], [0, 0, 1, 1], [], []>} : vector<128x128xf32>, vector<128x128xf32>, vector<128x128xf32> -> vector<128x128xf32>
    %c8_41 = arith.constant 8 : index
    %c0_42 = arith.constant 0 : index
    %62 = vector.load %arg3[%c8_41, %c0_42] : memref<64x128xf32, #tpu.memory_space<vmem>>, vector<1x128xf32>
    %63 = vector.broadcast %62 : vector<1x128xf32> to vector<128x128xf32>
    %64 = arith.addf %61, %63 : vector<128x128xf32>
    %cst_43 = arith.constant 0.000000e+00 : f32
    %65 = vector.broadcast %cst_43 : f32 to vector<128x128xf32>
    %66 = arith.maximumf %64, %65 : vector<128x128xf32>
    %c256_44 = arith.constant 256 : index
    %c0_45 = arith.constant 0 : index
    %67 = vector.load %arg2[%c256_44, %c0_45] : memref<1024x128xf32, #tpu.memory_space<vmem>>, vector<128x128xf32>
    %cst_46 = arith.constant dense<0.000000e+00> : vector<128x128xf32>
    %68 = tpu.matmul %66, %67, %cst_46 {dimension_numbers = #tpu.dot_dimension_numbers<[1], [0], [0], [1], [0, 0, 1, 1], [], []>} : vector<128x128xf32>, vector<128x128xf32>, vector<128x128xf32> -> vector<128x128xf32>
    %c16_47 = arith.constant 16 : index
    %c0_48 = arith.constant 0 : index
    %69 = vector.load %arg3[%c16_47, %c0_48] : memref<64x128xf32, #tpu.memory_space<vmem>>, vector<1x128xf32>
    %70 = vector.broadcast %69 : vector<1x128xf32> to vector<128x128xf32>
    %71 = arith.addf %68, %70 : vector<128x128xf32>
    %cst_49 = arith.constant 0.000000e+00 : f32
    %72 = vector.broadcast %cst_49 : f32 to vector<128x128xf32>
    %73 = arith.maximumf %71, %72 : vector<128x128xf32>
    %c384_50 = arith.constant 384 : index
    %c0_51 = arith.constant 0 : index
    %74 = vector.load %arg2[%c384_50, %c0_51] : memref<1024x128xf32, #tpu.memory_space<vmem>>, vector<128x128xf32>
    %cst_52 = arith.constant dense<0.000000e+00> : vector<128x128xf32>
    %75 = tpu.matmul %73, %74, %cst_52 {dimension_numbers = #tpu.dot_dimension_numbers<[1], [0], [0], [1], [0, 0, 1, 1], [], []>} : vector<128x128xf32>, vector<128x128xf32>, vector<128x128xf32> -> vector<128x128xf32>
    %c24_53 = arith.constant 24 : index
    %c0_54 = arith.constant 0 : index
    %76 = vector.load %arg3[%c24_53, %c0_54] : memref<64x128xf32, #tpu.memory_space<vmem>>, vector<1x128xf32>
    %77 = vector.broadcast %76 : vector<1x128xf32> to vector<128x128xf32>
    %78 = arith.addf %75, %77 : vector<128x128xf32>
    %c512_55 = arith.constant 512 : index
    %c0_56 = arith.constant 0 : index
    %79 = vector.load %arg2[%c512_55, %c0_56] : memref<1024x128xf32, #tpu.memory_space<vmem>>, vector<128x128xf32>
    %cst_57 = arith.constant dense<0.000000e+00> : vector<128x128xf32>
    %80 = tpu.matmul %78, %79, %cst_57 {dimension_numbers = #tpu.dot_dimension_numbers<[1], [0], [0], [1], [0, 0, 1, 1], [], []>} : vector<128x128xf32>, vector<128x128xf32>, vector<128x128xf32> -> vector<128x128xf32>
    %c32_58 = arith.constant 32 : index
    %c0_59 = arith.constant 0 : index
    %81 = vector.load %arg3[%c32_58, %c0_59] : memref<64x128xf32, #tpu.memory_space<vmem>>, vector<1x128xf32>
    %82 = vector.broadcast %81 : vector<1x128xf32> to vector<128x128xf32>
    %83 = arith.addf %80, %82 : vector<128x128xf32>
    %cst_60 = arith.constant 0.000000e+00 : f32
    %84 = vector.broadcast %cst_60 : f32 to vector<128x128xf32>
    %85 = arith.maximumf %83, %84 : vector<128x128xf32>
    %c640_61 = arith.constant 640 : index
    %c0_62 = arith.constant 0 : index
    %86 = vector.load %arg2[%c640_61, %c0_62] : memref<1024x128xf32, #tpu.memory_space<vmem>>, vector<128x128xf32>
    %cst_63 = arith.constant dense<0.000000e+00> : vector<128x128xf32>
    %87 = tpu.matmul %85, %86, %cst_63 {dimension_numbers = #tpu.dot_dimension_numbers<[1], [0], [0], [1], [0, 0, 1, 1], [], []>} : vector<128x128xf32>, vector<128x128xf32>, vector<128x128xf32> -> vector<128x128xf32>
    %c40_64 = arith.constant 40 : index
    %c0_65 = arith.constant 0 : index
    %88 = vector.load %arg3[%c40_64, %c0_65] : memref<64x128xf32, #tpu.memory_space<vmem>>, vector<1x128xf32>
    %89 = vector.broadcast %88 : vector<1x128xf32> to vector<128x128xf32>
    %90 = arith.addf %87, %89 : vector<128x128xf32>
    %cst_66 = arith.constant 0.000000e+00 : f32
    %91 = vector.broadcast %cst_66 : f32 to vector<128x128xf32>
    %92 = arith.maximumf %90, %91 : vector<128x128xf32>
    %c768_67 = arith.constant 768 : index
    %c0_68 = arith.constant 0 : index
    %93 = vector.load %arg2[%c768_67, %c0_68] : memref<1024x128xf32, #tpu.memory_space<vmem>>, vector<128x128xf32>
    %cst_69 = arith.constant dense<0.000000e+00> : vector<128x128xf32>
    %94 = tpu.matmul %92, %93, %cst_69 {dimension_numbers = #tpu.dot_dimension_numbers<[1], [0], [0], [1], [0, 0, 1, 1], [], []>} : vector<128x128xf32>, vector<128x128xf32>, vector<128x128xf32> -> vector<128x128xf32>
    %c48_70 = arith.constant 48 : index
    %c0_71 = arith.constant 0 : index
    %95 = vector.load %arg3[%c48_70, %c0_71] : memref<64x128xf32, #tpu.memory_space<vmem>>, vector<1x128xf32>
    %96 = vector.broadcast %95 : vector<1x128xf32> to vector<128x128xf32>
    %97 = arith.addf %94, %96 : vector<128x128xf32>
    %cst_72 = arith.constant 0.000000e+00 : f32
    %98 = vector.broadcast %cst_72 : f32 to vector<128x128xf32>
    %99 = arith.maximumf %97, %98 : vector<128x128xf32>
    %c896_73 = arith.constant 896 : index
    %c0_74 = arith.constant 0 : index
    %100 = vector.load %arg2[%c896_73, %c0_74] : memref<1024x128xf32, #tpu.memory_space<vmem>>, vector<128x128xf32>
    %cst_75 = arith.constant dense<0.000000e+00> : vector<128x128xf32>
    %101 = tpu.matmul %99, %100, %cst_75 {dimension_numbers = #tpu.dot_dimension_numbers<[1], [0], [0], [1], [0, 0, 1, 1], [], []>} : vector<128x128xf32>, vector<128x128xf32>, vector<128x128xf32> -> vector<128x128xf32>
    %c56_76 = arith.constant 56 : index
    %c0_77 = arith.constant 0 : index
    %102 = vector.load %arg3[%c56_76, %c0_77] : memref<64x128xf32, #tpu.memory_space<vmem>>, vector<1x128xf32>
    %103 = vector.broadcast %102 : vector<1x128xf32> to vector<128x128xf32>
    %104 = arith.addf %101, %103 : vector<128x128xf32>
    %c0_78 = arith.constant 0 : index
    %c0_79 = arith.constant 0 : index
    %105 = vector.load %arg4[%c0_78, %c0_79] : memref<128x256xf32, #tpu.memory_space<vmem>>, vector<128x128xf32>
    tpu.vector_store %arg4[%c0_78, %c0_79], %52 {strides = array<i32>} : memref<128x256xf32, #tpu.memory_space<vmem>>, vector<128x128xf32>,
    %c0_80 = arith.constant 0 : index
    %c128_81 = arith.constant 128 : index
    %106 = vector.load %arg4[%c0_80, %c128_81] : memref<128x256xf32, #tpu.memory_space<vmem>>, vector<128x128xf32>
    tpu.vector_store %arg4[%c0_80, %c128_81], %104 {strides = array<i32>} : memref<128x256xf32, #tpu.memory_space<vmem>>, vector<128x128xf32>,
    return
  }
  func.func @transform_0(%arg0: i32) -> (i32, i32) {
    %c0_i32 = arith.constant 0 : i32
    %c0_i32_0 = arith.constant 0 : i32
    return %arg0, %c0_i32 : i32, i32
  }
  func.func @transform_1(%arg0: i32) -> (i32, i32) {
    %c0_i32 = arith.constant 0 : i32
    %c0_i32_0 = arith.constant 0 : i32
    %c0_i32_1 = arith.constant 0 : i32
    return %c0_i32, %c0_i32_0 : i32, i32
  }
  func.func @transform_2(%arg0: i32) -> (i32, i32) {
    %c0_i32 = arith.constant 0 : i32
    %c0_i32_0 = arith.constant 0 : i32
    %c0_i32_1 = arith.constant 0 : i32
    return %c0_i32, %c0_i32_0 : i32, i32
  }
  func.func @transform_3(%arg0: i32) -> (i32, i32) {
    %c0_i32 = arith.constant 0 : i32
    %c0_i32_0 = arith.constant 0 : i32
    return %arg0, %c0_i32 : i32, i32
  }
}

</mosaic_0001>

<bundles_post_ra>
// kernel: usad_forward.1
= control target key start
LH: loop header
LB: loop body
LE: loop exit
PB: predicated region body
PF: predicated region fallthrough
CT: control target
= control target key end

     0   :  { %8 = vsyncpa [#allocation3], 0  ;;  %s5024_s12 = smov 0   ;;  %s5697_s0 = inlined_call_operand.vmem [shape: f32[256,128], index: 0, kind: input, shape index: {}]   ;;  %s5698_s1 = inlined_call_operand.hbm [shape: f32[1024,128], index: 1, kind: input, shape index: {}]   ;;  %s5699_s2 = inlined_call_operand.vmem [shape: f32[64,128], index: 2, kind: input, shape index: {}]   ;;  %s5700_s3 = inlined_call_operand.vmem [shape: f32[256,256], index: 3, kind: output, shape index: {}]  }
   0x1 LB: > { %s2989_s13 = sadd.s32 4294967295, %s4999_s12   ;;  %p2991_p0 = scmp.ge.s32.totalorder %s4999_s12, 1  ;;  %s4999_s12 = sphi %s5024_s12, %s14_s12  }
   0x2   : > { %p113_p1 = scmp.lt.s32.totalorder %s4999_s12, 3  ;;  %s5001_s14 = smov [#allocation2]  }
   0x3   : > { %s125_s15 = sshll.u32 %s5001_s14, 4  ;;  %p5038_p3 = scmp.eq.s32.totalorder %s2989_s13, 0  ;;  %s126_s15 = int_to_ptr.vmem [resolvable:$true] %s125_s15 }
   0x4   : > { %p5032_p2 = pnand %p2991_p0, %p113_p1  ;;  %s4961_s21 = scalar_lea.hbm %s5698_s1, 16384 }
   0x5   : > { %s5733_s17 = scalar_select %p5038_p3, 1, 0 }
   0x6   : > { %s5732_s16 = scalar_select %p5032_p2, 1, 0 }
   0x7   : > { %p4936_p4 = pneg %p5032_p2  ;;  %p4962_p6 = scmp.ne.s32.totalorder %s5698_s1, %s4961_s21 }
   0x8   : > { %p4968_p10 = scmp.lt.u32.totalorder %s4961_s21, %s5698_s1 }
   0x9   : > { %p5046_p5 = pnand %p5038_p3, %p4936_p4 }
   0xb   : > { %p4963_p7 = pneg %p5046_p5 }
   0xd   : > { %p4964_p8 = pnand %p4963_p7, %p4962_p6 }
   0xf   : > { %p4965_p9 = pneg %p4964_p8 }
  0x11   : > { %p4970_p11 = pnand %p4968_p10, %p4965_p9 }
  0x13   : > { %4973 = shalt.err (!%p4970_p11)
}
  0x14   : > { %s4974_s26 = scalar_lea.vmem %s126_s15, 16384  ;;  %p4982_p1 = scmp.lt.s32.totalorder %s126_s15, %s126_s15 }
  0x15   : > { %p4975_p12 = scmp.ne.s32.totalorder %s126_s15, %s4974_s26  ;;  %p4983_p4 = scmp.lt.s32.totalorder %s4974_s26, %s4974_s26 }
  0x17   : > { %p4977_p13 = pnand %p4975_p12, %p4963_p7  ;;  %p4984_p3 = por %p4983_p4, %p4982_p1 }
  0x19   : > { %p4978_p0 = pneg %p4977_p13 }
  0x1b   : > { %p4985_p2 = pnand %p4984_p3, %p4978_p0 }
  0x1d   : > { %4988 = shalt.err (!%p4985_p2)
}
  0x1e   : > { %s5002_s27 = smov 128   ;;  %s5003_s28 = smov 8  }
  0x1f   : > { %4939 = dma.hbm_to_vmem [thread:$0]  (!%p5046_p5), %s5698_s1, 16384, %s126_s15, [#allocation3], %s5002_s27, %s5002_s27, %s5003_s28  }
  0x20   : > { %p5735_p6 = scmp.ne.s32.totalorder %s5732_s16, 0 }
  0x22   : > { %153 = sbr.rel (%p5735_p6) target bundleno = 3587 (0xe03), region = 32 }
  0x29   : > { %p5736_p8 = scmp.ne.s32.totalorder %s5733_s17, 0 }
  0x2b   : > { %4994 = dma.done.wait (%p5736_p8), [#allocation3], 16384  }
  0x2c   : > { %4996 = vsyncadd (%p5736_p8), [#allocation3], 4294950912  ;;  %s2996_s4 = sshll.u32 %s2989_s13, 4  ;;  %v207_v0 = vld [vmem:[#allocation2] sm:$0xff]  ;;  %v208_v1 = vld [vmem:[#allocation2 + $0x8] sm:$0xff] }
  0x2d   : > { %p179_p2 = scmp.lt.s32.totalorder %s2996_s4, 31  ;;  %v209_v2 = vld [vmem:[#allocation2 + $0x10] sm:$0xff]  ;;  %v5077_v3 = vpack.c.bf16 %v208_v1, %v207_v0  ;;  %v210_v4 = vld [vmem:[#allocation2 + $0x18] sm:$0xff]  ;;  %v211_v6 = vld [vmem:[#allocation2 + $0x20] sm:$0xff] }
  0x2e   : > { %v5079_v5 = vpack.c.bf16 %v210_v4, %v209_v2  ;;  %v212_v7 = vld [vmem:[#allocation2 + $0x28] sm:$0xff]  ;;  %v213_v10 = vld [vmem:[#allocation2 + $0x30] sm:$0xff]  ;;  %v214_v11 = vld [vmem:[#allocation2 + $0x38] sm:$0xff] }
  0x2f   : > { %s5766_s4 = smov (!%p179_p2, %s2996_s4), 31  ;;  %4421 = vmatprep.subr.bf16.mxu0 %v5077_v3  ;;  %v5089_v8 = vpack.c.bf16 %v212_v7, %v211_v6  ;;  %v5094_v12 = vpack.c.bf16 %v214_v11, %v213_v10  ;;  %v215_v13 = vld [vmem:[#allocation2 + $0x40] sm:$0xff]  ;;  %v216_v14 = vld [vmem:[#allocation2 + $0x48] sm:$0xff]  ;;  %v391_v17 = vld [vmem:[#allocation2 + $0x90] sm:$0xff] }
  0x30   : > { %s2997_s5 = sshll.u32 %s5766_s4, 3  ;;  %4423 = vmatpush3.bf16.msra.mxu0 %v5077_v3  ;;  %v389_v15 = vld [vmem:[#allocation2 + $0x80] sm:$0xff]  ;;  %v390_v16 = vld [vmem:[#allocation2 + $0x88] sm:$0xff]  ;;  %v392_v18 = vld [vmem:[#allocation2 + $0x98] sm:$0xff]  ;;  %v5102_v21 = vpack.c.bf16 %v216_v14, %v215_v13  ;;  %s3011_s24 = sshll.u32 %s5766_s4, 4 }
  0x31   : > { %s5084_s8 = scalar_lea.vmem %s5697_s0, %s2997_s5  ;;  %4425 = vmatprep.subr.bf16.mxu0 %v5079_v5  ;;  %v5097_v19 = vpack.c.bf16 %v390_v16, %v389_v15  ;;  %v5099_v20 = vpack.c.bf16 %v392_v18, %v391_v17  ;;  %v393_v22 = vld [vmem:[#allocation2 + $0xa0] sm:$0xff]  ;;  %v394_v23 = vld [vmem:[#allocation2 + $0xa8] sm:$0xff]  ;;  %v217_v24 = vld [vmem:[#allocation2 + $0x50] sm:$0xff]  ;;  %s5454_s29 = scalar_lea.vmem %s5700_s3, %s3011_s24 }
  0x32   : > { %v191_v9 = vld [vmem:[%s5084_s8] sm:$0xff]  ;;  %v218_v25 = vld [vmem:[#allocation2 + $0x58] sm:$0xff]  ;;  %v5108_v26 = vpack.c.bf16 %v394_v23, %v393_v22  ;;  %v395_v28 = vld [vmem:[#allocation2 + $0xb0] sm:$0xff] }
  0x33   : > { %3556 = vmatprep.mubr.f32.mxu0 %v191_v9  ;;  %4453 = vmatprep.subr.bf16.mxu1 %v5097_v19  ;;  %v5111_v27 = vpack.c.bf16 %v218_v25, %v217_v24  ;;  %v396_v29 = vld [vmem:[#allocation2 + $0xb8] sm:$0xff]  ;;  %v219_v30 = vld [vmem:[#allocation2 + $0x60] sm:$0xff]  ;;  %v220_v31 = vld [vmem:[#allocation2 + $0x68] sm:$0xff] }
  0x34   : > { %4427 = vmatpush3.bf16.msra.mxu0 %v5079_v5  ;;  %4455 = vmatpush3.bf16.msra.mxu1 %v5097_v19  ;;  %v5116_v32 = vpack.c.bf16 %v396_v29, %v395_v28  ;;  %v5119_v33 = vpack.c.bf16 %v220_v31, %v219_v30  ;;  %v397_v34 = vld [vmem:[#allocation2 + $0xc0] sm:$0xff]  ;;  %v398_v35 = vld [vmem:[#allocation2 + $0xc8] sm:$0xff]  ;;  %v221_v36 = vld [vmem:[#allocation2 + $0x70] sm:$0xff] }
  0x35   : > { %4429 = vmatprep.subr.bf16.mxu0 %v5089_v8  ;;  %4457 = vmatprep.subr.bf16.mxu1 %v5099_v20  ;;  %v222_v37 = vld [vmem:[#allocation2 + $0x78] sm:$0xff]  ;;  %v5124_v38 = vpack.c.bf16 %v398_v35, %v397_v34  ;;  %v399_v40 = vld [vmem:[#allocation2 + $0xd0] sm:$0xff]  ;;  %v401_v43 = vld [vmem:[#allocation2 + $0xe0] sm:$0xff] }
  0x36   : > { %v5127_v39 = vpack.c.bf16 %v222_v37, %v221_v36  ;;  %v400_v41 = vld [vmem:[#allocation2 + $0xd8] sm:$0xff]  ;;  %v402_v44 = vld [vmem:[#allocation2 + $0xe8] sm:$0xff]  ;;  %v193_v47 = vld [vmem:[%s5084_s8 + $0x10] sm:$0xff] }
  0x37   : > { %v5132_v42 = vpack.c.bf16 %v400_v41, %v399_v40  ;;  %v192_v45 = vld [vmem:[%s5084_s8 + $0x8] sm:$0xff]  ;;  %v5139_v46 = vpack.c.bf16 %v402_v44, %v401_v43  ;;  %v194_v48 = vld [vmem:[%s5084_s8 + $0x18] sm:$0xff]  ;;  %v195_v49 = vld [vmem:[%s5084_s8 + $0x20] sm:$0xff] }
  0x38   : > { %4431 = vmatpush3.bf16.msra.mxu0 %v5089_v8  ;;  %4459 = vmatpush3.bf16.msra.mxu1 %v5099_v20  ;;  %v196_v50 = vld [vmem:[%s5084_s8 + $0x28] sm:$0xff]  ;;  %v197_v51 = vld [vmem:[%s5084_s8 + $0x30] sm:$0xff]  ;;  %v198_v52 = vld [vmem:[%s5084_s8 + $0x38] sm:$0xff] }
  0x39   : > { %4433 = vmatprep.subr.bf16.mxu0 %v5094_v12  ;;  %4461 = vmatprep.subr.bf16.mxu1 %v5108_v26  ;;  %v199_v53 = vld [vmem:[%s5084_s8 + $0x40] sm:$0xff]  ;;  %v200_v54 = vld [vmem:[%s5084_s8 + $0x48] sm:$0xff]  ;;  %v201_v55 = vld [vmem:[%s5084_s8 + $0x50] sm:$0xff] }
  0x3a   : > { %v202_v56 = vld [vmem:[%s5084_s8 + $0x58] sm:$0xff]  ;;  %v203_v57 = vld [vmem:[%s5084_s8 + $0x60] sm:$0xff]  ;;  %v204_v58 = vld [vmem:[%s5084_s8 + $0x68] sm:$0xff] }
  0x3b   : > { %v205_v59 = vld [vmem:[%s5084_s8 + $0x70] sm:$0xff]  ;;  %v206_v60 = vld [vmem:[%s5084_s8 + $0x78] sm:$0xff]  ;;  %v571_v0 = vld [vmem:[#allocation2 + $0x100] sm:$0xff] }
  0x3c   : > { %4435 = vmatpush3.bf16.msra.mxu0 %v5094_v12  ;;  %4463 = vmatpush3.bf16.msra.mxu1 %v5108_v26  ;;  %v403_v61 = vld [vmem:[#allocation2 + $0xf0] sm:$0xff]  ;;  %v404_v62 = vld [vmem:[#allocation2 + $0xf8] sm:$0xff]  ;;  %v572_v1 = vld [vmem:[#allocation2 + $0x108] sm:$0xff] }
  0x3d   : > { %4437 = vmatprep.subr.bf16.mxu0 %v5102_v21  ;;  %4465 = vmatprep.subr.bf16.mxu1 %v5116_v32  ;;  %v5158_v63 = vpack.c.bf16 %v404_v62, %v403_v61  ;;  %v573_v2 = vld [vmem:[#allocation2 + $0x110] sm:$0xff]  ;;  %v5162_v4 = vpack.c.bf16 %v572_v1, %v571_v0  ;;  %v574_v6 = vld [vmem:[#allocation2 + $0x118] sm:$0xff]  ;;  %v575_v9 = vld [vmem:[#allocation2 + $0x120] sm:$0xff] }
  0x3e   : > { %v5164_v7 = vpack.c.bf16 %v574_v6, %v573_v2  ;;  %v576_v10 = vld [vmem:[#allocation2 + $0x128] sm:$0xff]  ;;  %v577_v13 = vld [vmem:[#allocation2 + $0x130] sm:$0xff]  ;;  %v578_v14 = vld [vmem:[#allocation2 + $0x138] sm:$0xff] }
  0x3f   : > { %v5169_v11 = vpack.c.bf16 %v576_v10, %v575_v9  ;;  %v5173_v15 = vpack.c.bf16 %v578_v14, %v577_v13  ;;  %v579_v16 = vld [vmem:[#allocation2 + $0x140] sm:$0xff]  ;;  %v580_v17 = vld [vmem:[#allocation2 + $0x148] sm:$0xff]  ;;  %v581_v22 = vld [vmem:[#allocation2 + $0x150] sm:$0xff] }
  0x40   : > { %4439 = vmatpush3.bf16.msra.mxu0 %v5102_v21  ;;  %4467 = vmatpush3.bf16.msra.mxu1 %v5116_v32  ;;  %v5177_v18 = vpack.c.bf16 %v580_v17, %v579_v16  ;;  %v582_v23 = vld [vmem:[#allocation2 + $0x158] sm:$0xff]  ;;  %v583_v25 = vld [vmem:[#allocation2 + $0x160] sm:$0xff]  ;;  %v584_v28 = vld [vmem:[#allocation2 + $0x168] sm:$0xff] }
  0x41   : > { %4441 = vmatprep.subr.bf16.mxu0 %v5111_v27  ;;  %4469 = vmatprep.subr.bf16.mxu1 %v5124_v38  ;;  %v5181_v24 = vpack.c.bf16 %v582_v23, %v581_v22  ;;  %v5185_v29 = vpack.c.bf16 %v584_v28, %v583_v25  ;;  %v3001_v30 = vld [vmem:[%s5699_s2] ss:$0 sm:$0xff] }
  0x44   : > { %4443 = vmatpush3.bf16.msra.mxu0 %v5111_v27  ;;  %4471 = vmatpush3.bf16.msra.mxu1 %v5124_v38 }
  0x45   : > { %4445 = vmatprep.subr.bf16.mxu0 %v5119_v33  ;;  %4473 = vmatprep.subr.bf16.mxu1 %v5132_v42 }
  0x48   : > { %4447 = vmatpush3.bf16.msra.mxu0 %v5119_v33  ;;  %4475 = vmatpush3.bf16.msra.mxu1 %v5132_v42 }
  0x49   : > { %4449 = vmatprep.subr.bf16.mxu0 %v5127_v39  ;;  %4477 = vmatprep.subr.bf16.mxu1 %v5139_v46 }
  0x4c   : > { %4451 = vmatpush3.bf16.msra.mxu0 %v5127_v39  ;;  %4479 = vmatpush3.bf16.msra.mxu1 %v5139_v46 }
  0x4d   : > { %4481 = vmatprep.subr.bf16.mxu1 %v5158_v63  ;;  %4485 = vmatprep.subr.bf16.mxu0 %v5162_v4 }
  0x4f   : > { %3557 = vmatmul.mubr.f32.vlgmr.msra.gmra.mrb[0].mxu0 %v192_v45 }
  0x50   : > { %3559 = vmatprep.mubr.f32.mxu0 %v193_v47  ;;  %4483 = vmatpush3.bf16.msra.mxu1 %v5158_v63 }
  0x51   : > { %4487 = vmatpush3.bf16.msra.mxu0 %v5162_v4 }
  0x52   : > { %4489 = vmatprep.subr.bf16.mxu0 %v5164_v7 }
  0x53   : > { %3560 = vmatmul.mubr.f32.gmra.mrb[2].mxu0 %v194_v48 }
  0x54   : > { %3562 = vmatprep.mubr.f32.mxu0 %v195_v49 }
  0x55   : > { %4491 = vmatpush3.bf16.msra.mxu0 %v5164_v7 }
  0x56   : > { %4493 = vmatprep.subr.bf16.mxu0 %v5169_v11 }
  0x57   : > { %3563 = vmatmul.mubr.f32.gmra.mrb[4].mxu0 %v196_v50 }
  0x58   : > { %3565 = vmatprep.mubr.f32.mxu0 %v197_v51 }
  0x59   : > { %4495 = vmatpush3.bf16.msra.mxu0 %v5169_v11 }
  0x5a   : > { %4497 = vmatprep.subr.bf16.mxu0 %v5173_v15 }
  0x5b   : > { %3566 = vmatmul.mubr.f32.gmra.mrb[6].mxu0 %v198_v52 }
  0x5c   : > { %3568 = vmatprep.mubr.f32.mxu0 %v199_v53 }
  0x5d   : > { %4499 = vmatpush3.bf16.msra.mxu0 %v5173_v15 }
  0x5e   : > { %4501 = vmatprep.subr.bf16.mxu0 %v5177_v18 }
  0x5f   : > { %3569 = vmatmul.mubr.f32.gmra.mrb[8].mxu0 %v200_v54 }
  0x60   : > { %3571 = vmatprep.mubr.f32.mxu0 %v201_v55 }
  0x61   : > { %4503 = vmatpush3.bf16.msra.mxu0 %v5177_v18 }
  0x62   : > { %4505 = vmatprep.subr.bf16.mxu0 %v5181_v24 }
  0x63   : > { %3572 = vmatmul.mubr.f32.gmra.mrb[10].mxu0 %v202_v56 }
  0x64   : > { %3574 = vmatprep.mubr.f32.mxu0 %v203_v57 }
  0x65   : > { %4507 = vmatpush3.bf16.msra.mxu0 %v5181_v24 }
  0x66   : > { %4509 = vmatprep.subr.bf16.mxu0 %v5185_v29 }
  0x67   : > { %3575 = vmatmul.mubr.f32.gmra.mrb[12].mxu0 %v204_v58 }
  0x68   : > { %3577 = vmatprep.mubr.f32.mxu0 %v205_v59 }
  0x69   : > { %4511 = vmatpush3.bf16.msra.mxu0 %v5185_v29 }
  0x6b   : > { %3578 = vmatmul.mubr.f32.gmra.mrb[14].mxu0 %v206_v60 }
 0x122   : > { %v3558_v31 = vpop.f32.mrb[0].mxu0 }
 0x123   : > { %v300_v34 = vadd.f32 %v3558_v31, %v3001_v30  ;;  %v294_v35 = vpop.f32.mrb[1].mxu0 }
 0x124   : > { %v295_v36 = vadd.f32 %v3001_v30, %v294_v35 }
 0x125   : > { %v374_v41 = vmax.f32 %v300_v34, 0.0 }
 0x126   : > { %v3561_v37 = vpop.f32.mrb[2].mxu0  ;;  %v373_v40 = vmax.f32 %v295_v36, 0.0 }
 0x127   : > { %v310_v43 = vadd.f32 %v3561_v37, %v3001_v30  ;;  %v304_v44 = vpop.f32.mrb[3].mxu0 }
 0x128   : > { %v305_v45 = vadd.f32 %v3001_v30, %v304_v44  ;;  %3612 = vmatprep.mubr.f32.mxu1 %v373_v40  ;;  %v585_v44 = vld [vmem:[#allocation2 + $0x170] sm:$0xff] }
 0x129   : > { %3613 = vmatmul.mubr.f32.vlgmr.msra.gmra.mrb[0].mxu1 %v374_v41  ;;  %v376_v49 = vmax.f32 %v310_v43, 0.0 }
 0x12a   : > { %v375_v47 = vmax.f32 %v305_v45, 0.0  ;;  %v3564_v48 = vpop.f32.mrb[4].mxu0  ;;  %v586_v45 = vld [vmem:[#allocation2 + $0x178] sm:$0xff] }
 0x12b   : > { %v320_v50 = vadd.f32 %v3564_v48, %v3001_v30  ;;  %v314_v51 = vpop.f32.mrb[5].mxu0  ;;  %v753_v48 = vld [vmem:[#allocation2 + $0x180] sm:$0xff] }
 0x12c   : > { %v315_v52 = vadd.f32 %v3001_v30, %v314_v51  ;;  %3615 = vmatprep.mubr.f32.mxu1 %v375_v47  ;;  %v5193_v47 = vpack.c.bf16 %v586_v45, %v585_v44 }
 0x12d   : > { %3616 = vmatmul.mubr.f32.gmra.mrb[2].mxu1 %v376_v49  ;;  %v378_v55 = vmax.f32 %v320_v50, 0.0  ;;  %v754_v49 = vld [vmem:[#allocation2 + $0x188] sm:$0xff]  ;;  %v755_v50 = vld [vmem:[#allocation2 + $0x190] sm:$0xff] }
 0x12e   : > { %v377_v53 = vmax.f32 %v315_v52, 0.0  ;;  %v3567_v54 = vpop.f32.mrb[6].mxu0  ;;  %4513 = vmatprep.subr.bf16.mxu0 %v5193_v47  ;;  %v5197_v51 = vpack.c.bf16 %v754_v49, %v753_v48 }
 0x12f   : > { %v330_v56 = vadd.f32 %v3567_v54, %v3001_v30  ;;  %v324_v57 = vpop.f32.mrb[7].mxu0  ;;  %4515 = vmatpush3.bf16.msra.mxu0 %v5193_v47  ;;  %v758_v54 = vld [vmem:[#allocation2 + $0x1a8] sm:$0xff] }
 0x130   : > { %v325_v58 = vadd.f32 %v3001_v30, %v324_v57  ;;  %3618 = vmatprep.mubr.f32.mxu1 %v377_v53  ;;  %v757_v53 = vld [vmem:[#allocation2 + $0x1a0] sm:$0xff]  ;;  %4517 = vmatprep.subr.bf16.mxu1 %v5197_v51  ;;  %v760_v57 = vld [vmem:[#allocation2 + $0x1b8] sm:$0xff] }
 0x131   : > { %3619 = vmatmul.mubr.f32.gmra.mrb[4].mxu1 %v378_v55  ;;  %v380_v61 = vmax.f32 %v330_v56, 0.0  ;;  %v5204_v55 = vpack.c.bf16 %v758_v54, %v757_v53  ;;  %v759_v56 = vld [vmem:[#allocation2 + $0x1b0] sm:$0xff] }
 0x132   : > { %v379_v59 = vmax.f32 %v325_v58, 0.0  ;;  %v3570_v60 = vpop.f32.mrb[8].mxu0  ;;  %4519 = vmatpush3.bf16.msra.mxu1 %v5197_v51  ;;  %v5208_v58 = vpack.c.bf16 %v760_v57, %v759_v56 }
 0x133   : > { %v340_v62 = vadd.f32 %v3570_v60, %v3001_v30  ;;  %v334_v0 = vpop.f32.mrb[9].mxu0  ;;  %v762_v60 = vld [vmem:[#allocation2 + $0x1c8] sm:$0xff] }
 0x134   : > { %v335_v1 = vadd.f32 %v3001_v30, %v334_v0  ;;  %3621 = vmatprep.mubr.f32.mxu1 %v379_v59  ;;  %v761_v59 = vld [vmem:[#allocation2 + $0x1c0] sm:$0xff]  ;;  %v764_v0 = vld [vmem:[#allocation2 + $0x1d8] sm:$0xff] }
 0x135   : > { %3622 = vmatmul.mubr.f32.gmra.mrb[6].mxu1 %v380_v61  ;;  %v382_v9 = vmax.f32 %v340_v62, 0.0  ;;  %v5212_v61 = vpack.c.bf16 %v762_v60, %v761_v59  ;;  %v763_v62 = vld [vmem:[#allocation2 + $0x1d0] sm:$0xff] }
 0x136   : > { %v381_v2 = vmax.f32 %v335_v1, 0.0  ;;  %v3573_v6 = vpop.f32.mrb[10].mxu0  ;;  %v5216_v1 = vpack.c.bf16 %v764_v0, %v763_v62 }
 0x137   : > { %v350_v10 = vadd.f32 %v3573_v6, %v3001_v30  ;;  %v344_v13 = vpop.f32.mrb[11].mxu0  ;;  %v766_v6 = vld [vmem:[#allocation2 + $0x1e8] sm:$0xff] }
 0x138   : > { %v345_v14 = vadd.f32 %v3001_v30, %v344_v13  ;;  %3624 = vmatprep.mubr.f32.mxu1 %v381_v2  ;;  %v765_v2 = vld [vmem:[#allocation2 + $0x1e0] sm:$0xff] }
 0x139   : > { %3625 = vmatmul.mubr.f32.gmra.mrb[8].mxu1 %v382_v9  ;;  %v384_v22 = vmax.f32 %v350_v10, 0.0  ;;  %v5220_v9 = vpack.c.bf16 %v766_v6, %v765_v2  ;;  %v3002_v10 = vld [vmem:[%s5699_s2 + $0x8] ss:$0 sm:$0xff] }
 0x13a   : > { %v383_v16 = vmax.f32 %v345_v14, 0.0  ;;  %v3576_v17 = vpop.f32.mrb[12].mxu0 }
 0x13b   : > { %v360_v23 = vadd.f32 %v3576_v17, %v3001_v30  ;;  %v354_v25 = vpop.f32.mrb[13].mxu0 }
 0x13c   : > { %v355_v28 = vadd.f32 %v3001_v30, %v354_v25  ;;  %3627 = vmatprep.mubr.f32.mxu1 %v383_v16 }
 0x13d   : > { %3628 = vmatmul.mubr.f32.gmra.mrb[10].mxu1 %v384_v22  ;;  %v386_v35 = vmax.f32 %v360_v23, 0.0 }
 0x13e   : > { %v385_v31 = vmax.f32 %v355_v28, 0.0  ;;  %v3579_v34 = vpop.f32.mrb[14].mxu0 }
 0x13f   : > { %v370_v36 = vadd.f32 %v3579_v34, %v3001_v30  ;;  %v364_v37 = vpop.f32.mrb[15].mxu0 }
 0x140   : > { %v365_v40 = vadd.f32 %v3001_v30, %v364_v37  ;;  %3630 = vmatprep.mubr.f32.mxu1 %v385_v31  ;;  %v756_v30 = vld [vmem:[#allocation2 + $0x198] sm:$0xff] }
 0x141   : > { %3631 = vmatmul.mubr.f32.gmra.mrb[12].mxu1 %v386_v35  ;;  %v388_v43 = vmax.f32 %v370_v36, 0.0  ;;  %v5199_v52 = vpack.c.bf16 %v756_v30, %v755_v50 }
 0x142   : > { %v387_v41 = vmax.f32 %v365_v40, 0.0 }
 0x143   : > { %4521 = vmatprep.subr.bf16.mxu1 %v5199_v52 }
 0x144   : > { %3633 = vmatprep.mubr.f32.mxu1 %v387_v41  ;;  %4523 = vmatpush3.bf16.msra.mxu1 %v5199_v52 }
 0x145   : > { %3634 = vmatmul.mubr.f32.gmra.mrb[14].mxu1 %v388_v43  ;;  %4525 = vmatprep.subr.bf16.mxu1 %v5204_v55 }
 0x148   : > { %4527 = vmatpush3.bf16.msra.mxu1 %v5204_v55 }
 0x149   : > { %4529 = vmatprep.subr.bf16.mxu1 %v5208_v58 }
 0x14c   : > { %4531 = vmatpush3.bf16.msra.mxu1 %v5208_v58 }
 0x14d   : > { %4533 = vmatprep.subr.bf16.mxu1 %v5212_v61 }
 0x150   : > { %4535 = vmatpush3.bf16.msra.mxu1 %v5212_v61 }
 0x151   : > { %4537 = vmatprep.subr.bf16.mxu1 %v5216_v1 }
 0x154   : > { %4539 = vmatpush3.bf16.msra.mxu1 %v5216_v1 }
 0x155   : > { %4541 = vmatprep.subr.bf16.mxu1 %v5220_v9 }
 0x158   : > { %4543 = vmatpush3.bf16.msra.mxu1 %v5220_v9 }
 0x1fc   : > { %v3614_v13 = vpop.f32.mrb[0].mxu1 }
 0x1fd   : > { %v482_v14 = vadd.f32 %v3614_v13, %v3002_v10  ;;  %v476_v16 = vpop.f32.mrb[1].mxu1 }
 0x1fe   : > { %v477_v17 = vadd.f32 %v3002_v10, %v476_v16 }
 0x1ff   : > { %v556_v25 = vmax.f32 %v482_v14, 0.0 }
 0x200   : > { %v555_v22 = vmax.f32 %v477_v17, 0.0  ;;  %v3617_v23 = vpop.f32.mrb[2].mxu1 }
 0x201   : > { %v492_v28 = vadd.f32 %v3617_v23, %v3002_v10  ;;  %v486_v31 = vpop.f32.mrb[3].mxu1 }
 0x202   : > { %v487_v34 = vadd.f32 %v3002_v10, %v486_v31  ;;  %3668 = vmatprep.mubr.f32.mxu0 %v555_v22 }
 0x203   : > { %3669 = vmatmul.mubr.f32.vlgmr.msra.gmra.mrb[16].mxu0 %v556_v25  ;;  %v558_v37 = vmax.f32 %v492_v28, 0.0 }
 0x204   : > { %v557_v35 = vmax.f32 %v487_v34, 0.0  ;;  %v3620_v36 = vpop.f32.mrb[4].mxu1 }
 0x205   : > { %v502_v40 = vadd.f32 %v3620_v36, %v3002_v10  ;;  %v496_v41 = vpop.f32.mrb[5].mxu1 }
 0x206   : > { %v497_v43 = vadd.f32 %v3002_v10, %v496_v41  ;;  %3671 = vmatprep.mubr.f32.mxu0 %v557_v35 }
 0x207   : > { %3672 = vmatmul.mubr.f32.gmra.mrb[18].mxu0 %v558_v37  ;;  %v560_v48 = vmax.f32 %v502_v40, 0.0 }
 0x208   : > { %v559_v44 = vmax.f32 %v497_v43, 0.0  ;;  %v3623_v45 = vpop.f32.mrb[6].mxu1 }
 0x209   : > { %v512_v49 = vadd.f32 %v3623_v45, %v3002_v10  ;;  %v506_v50 = vpop.f32.mrb[7].mxu1  ;;  %v768_v45 = vld [vmem:[#allocation2 + $0x1f8] sm:$0xff] }
 0x20a   : > { %v507_v30 = vadd.f32 %v3002_v10, %v506_v50  ;;  %3674 = vmatprep.mubr.f32.mxu0 %v559_v44  ;;  %v767_v44 = vld [vmem:[#allocation2 + $0x1f0] sm:$0xff]  ;;  %v920_v50 = vld [vmem:[#allocation2 + $0x208] sm:$0xff] }
 0x20b   : > { %3675 = vmatmul.mubr.f32.gmra.mrb[20].mxu0 %v560_v48  ;;  %v562_v56 = vmax.f32 %v512_v49, 0.0  ;;  %v5228_v48 = vpack.c.bf16 %v768_v45, %v767_v44  ;;  %v919_v49 = vld [vmem:[#allocation2 + $0x200] sm:$0xff] }
 0x20c   : > { %v561_v53 = vmax.f32 %v507_v30, 0.0  ;;  %v3626_v54 = vpop.f32.mrb[8].mxu1  ;;  %v921_v30 = vld [vmem:[#allocation2 + $0x210] sm:$0xff] }
 0x20d   : > { %v522_v57 = vadd.f32 %v3626_v54, %v3002_v10  ;;  %v516_v59 = vpop.f32.mrb[9].mxu1  ;;  %4545 = vmatprep.subr.bf16.mxu1 %v5228_v48 }
 0x20e   : > { %v517_v60 = vadd.f32 %v3002_v10, %v516_v59  ;;  %3677 = vmatprep.mubr.f32.mxu0 %v561_v53  ;;  %4547 = vmatpush3.bf16.msra.mxu1 %v5228_v48  ;;  %v5232_v53 = vpack.c.bf16 %v920_v50, %v919_v49 }
 0x20f   : > { %3678 = vmatmul.mubr.f32.gmra.mrb[22].mxu0 %v562_v56  ;;  %v564_v2 = vmax.f32 %v522_v57, 0.0  ;;  %v923_v56 = vld [vmem:[#allocation2 + $0x220] sm:$0xff]  ;;  %v924_v57 = vld [vmem:[#allocation2 + $0x228] sm:$0xff] }
 0x210   : > { %v563_v62 = vmax.f32 %v517_v60, 0.0  ;;  %v3629_v0 = vpop.f32.mrb[10].mxu1  ;;  %4549 = vmatprep.subr.bf16.mxu0 %v5232_v53  ;;  %v5239_v59 = vpack.c.bf16 %v924_v57, %v923_v56  ;;  %v925_v60 = vld [vmem:[#allocation2 + $0x230] sm:$0xff] }
 0x211   : > { %v532_v6 = vadd.f32 %v3629_v0, %v3002_v10  ;;  %v526_v13 = vpop.f32.mrb[11].mxu1  ;;  %4551 = vmatpush3.bf16.msra.mxu0 %v5232_v53 }
 0x212   : > { %v527_v14 = vadd.f32 %v3002_v10, %v526_v13  ;;  %3680 = vmatprep.mubr.f32.mxu0 %v563_v62  ;;  %v926_v62 = vld [vmem:[#allocation2 + $0x238] sm:$0xff] }
 0x213   : > { %3681 = vmatmul.mubr.f32.gmra.mrb[24].mxu0 %v564_v2  ;;  %v566_v22 = vmax.f32 %v532_v6, 0.0  ;;  %v5243_v0 = vpack.c.bf16 %v926_v62, %v925_v60  ;;  %v927_v2 = vld [vmem:[#allocation2 + $0x240] sm:$0xff]  ;;  %v928_v6 = vld [vmem:[#allocation2 + $0x248] sm:$0xff] }
 0x214   : > { %v565_v16 = vmax.f32 %v527_v14, 0.0  ;;  %v3632_v17 = vpop.f32.mrb[12].mxu1  ;;  %v5247_v13 = vpack.c.bf16 %v928_v6, %v927_v2  ;;  %v929_v14 = vld [vmem:[#allocation2 + $0x250] sm:$0xff] }
 0x215   : > { %v542_v23 = vadd.f32 %v3632_v17, %v3002_v10  ;;  %v536_v25 = vpop.f32.mrb[13].mxu1 }
 0x216   : > { %v537_v28 = vadd.f32 %v3002_v10, %v536_v25  ;;  %3683 = vmatprep.mubr.f32.mxu0 %v565_v16  ;;  %v930_v16 = vld [vmem:[#allocation2 + $0x258] sm:$0xff] }
 0x217   : > { %3684 = vmatmul.mubr.f32.gmra.mrb[26].mxu0 %v566_v22  ;;  %v568_v35 = vmax.f32 %v542_v23, 0.0  ;;  %v5251_v17 = vpack.c.bf16 %v930_v16, %v929_v14  ;;  %v931_v22 = vld [vmem:[#allocation2 + $0x260] sm:$0xff]  ;;  %v932_v23 = vld [vmem:[#allocation2 + $0x268] sm:$0xff] }
 0x218   : > { %v567_v31 = vmax.f32 %v537_v28, 0.0  ;;  %v3635_v34 = vpop.f32.mrb[14].mxu1  ;;  %v5255_v25 = vpack.c.bf16 %v932_v23, %v931_v22  ;;  %v3003_v28 = vld [vmem:[%s5699_s2 + $0x10] ss:$0 sm:$0xff] }
 0x219   : > { %v552_v36 = vadd.f32 %v3635_v34, %v3002_v10  ;;  %v546_v37 = vpop.f32.mrb[15].mxu1 }
 0x21a   : > { %v547_v40 = vadd.f32 %v3002_v10, %v546_v37  ;;  %3686 = vmatprep.mubr.f32.mxu0 %v567_v31  ;;  %v922_v10 = vld [vmem:[#allocation2 + $0x218] sm:$0xff] }
 0x21b   : > { %3687 = vmatmul.mubr.f32.gmra.mrb[28].mxu0 %v568_v35  ;;  %v570_v43 = vmax.f32 %v552_v36, 0.0  ;;  %v5234_v54 = vpack.c.bf16 %v922_v10, %v921_v30 }
 0x21c   : > { %v569_v41 = vmax.f32 %v547_v40, 0.0 }
 0x21d   : > { %4553 = vmatprep.subr.bf16.mxu0 %v5234_v54 }
 0x21e   : > { %3689 = vmatprep.mubr.f32.mxu0 %v569_v41  ;;  %4555 = vmatpush3.bf16.msra.mxu0 %v5234_v54 }
 0x21f   : > { %3690 = vmatmul.mubr.f32.gmra.mrb[30].mxu0 %v570_v43  ;;  %4557 = vmatprep.subr.bf16.mxu0 %v5239_v59 }
 0x222   : > { %4559 = vmatpush3.bf16.msra.mxu0 %v5239_v59 }
 0x223   : > { %4561 = vmatprep.subr.bf16.mxu0 %v5243_v0 }
 0x226   : > { %4563 = vmatpush3.bf16.msra.mxu0 %v5243_v0 }
 0x227   : > { %4565 = vmatprep.subr.bf16.mxu0 %v5247_v13 }
 0x22a   : > { %4567 = vmatpush3.bf16.msra.mxu0 %v5247_v13 }
 0x22b   : > { %4569 = vmatprep.subr.bf16.mxu0 %v5251_v17 }
 0x22e   : > { %4571 = vmatpush3.bf16.msra.mxu0 %v5251_v17 }
 0x22f   : > { %4573 = vmatprep.subr.bf16.mxu0 %v5255_v25 }
 0x232   : > { %4575 = vmatpush3.bf16.msra.mxu0 %v5255_v25 }
 0x2d6   : > { %v3670_v31 = vpop.f32.mrb[16].mxu0 }
 0x2d7   : > { %v664_v34 = vadd.f32 %v3670_v31, %v3003_v28  ;;  %v658_v35 = vpop.f32.mrb[17].mxu0 }
 0x2d8   : > { %v659_v36 = vadd.f32 %v3003_v28, %v658_v35 }
 0x2d9   : > { %v738_v41 = vmax.f32 %v664_v34, 0.0 }
 0x2da   : > { %v737_v37 = vmax.f32 %v659_v36, 0.0  ;;  %v3673_v40 = vpop.f32.mrb[18].mxu0 }
 0x2db   : > { %v674_v43 = vadd.f32 %v3673_v40, %v3003_v28  ;;  %v668_v44 = vpop.f32.mrb[19].mxu0 }
 0x2dc   : > { %v669_v45 = vadd.f32 %v3003_v28, %v668_v44  ;;  %3724 = vmatprep.mubr.f32.mxu1 %v737_v37 }
 0x2dd   : > { %3725 = vmatmul.mubr.f32.vlgmr.msra.gmra.mrb[16].mxu1 %v738_v41  ;;  %v740_v30 = vmax.f32 %v674_v43, 0.0 }
 0x2de   : > { %v739_v49 = vmax.f32 %v669_v45, 0.0  ;;  %v3676_v50 = vpop.f32.mrb[20].mxu0 }
 0x2df   : > { %v684_v10 = vadd.f32 %v3676_v50, %v3003_v28  ;;  %v678_v56 = vpop.f32.mrb[21].mxu0 }
 0x2e0   : > { %v679_v57 = vadd.f32 %v3003_v28, %v678_v56  ;;  %3727 = vmatprep.mubr.f32.mxu1 %v739_v49 }
 0x2e1   : > { %3728 = vmatmul.mubr.f32.gmra.mrb[18].mxu1 %v740_v30  ;;  %v742_v2 = vmax.f32 %v684_v10, 0.0 }
 0x2e2   : > { %v741_v60 = vmax.f32 %v679_v57, 0.0  ;;  %v3679_v62 = vpop.f32.mrb[22].mxu0 }
 0x2e3   : > { %v694_v6 = vadd.f32 %v3679_v62, %v3003_v28  ;;  %v688_v14 = vpop.f32.mrb[23].mxu0 }
 0x2e4   : > { %v689_v16 = vadd.f32 %v3003_v28, %v688_v14  ;;  %3730 = vmatprep.mubr.f32.mxu1 %v741_v60 }
 0x2e5   : > { %3731 = vmatmul.mubr.f32.gmra.mrb[20].mxu1 %v742_v2  ;;  %v744_v31 = vmax.f32 %v694_v6, 0.0 }
 0x2e6   : > { %v743_v22 = vmax.f32 %v689_v16, 0.0  ;;  %v3682_v23 = vpop.f32.mrb[24].mxu0 }
 0x2e7   : > { %v704_v34 = vadd.f32 %v3682_v23, %v3003_v28  ;;  %v698_v35 = vpop.f32.mrb[25].mxu0 }
 0x2e8   : > { %v699_v36 = vadd.f32 %v3003_v28, %v698_v35  ;;  %3733 = vmatprep.mubr.f32.mxu1 %v743_v22 }
 0x2e9   : > { %3734 = vmatmul.mubr.f32.gmra.mrb[22].mxu1 %v744_v31  ;;  %v746_v41 = vmax.f32 %v704_v34, 0.0  ;;  %v933_v31 = vld [vmem:[#allocation2 + $0x270] sm:$0xff]  ;;  %v934_v34 = vld [vmem:[#allocation2 + $0x278] sm:$0xff] }
 0x2ea   : > { %v745_v37 = vmax.f32 %v699_v36, 0.0  ;;  %v3685_v40 = vpop.f32.mrb[26].mxu0  ;;  %v5263_v35 = vpack.c.bf16 %v934_v34, %v933_v31  ;;  %v1101_v36 = vld [vmem:[#allocation2 + $0x280] sm:$0xff] }
 0x2eb   : > { %v714_v43 = vadd.f32 %v3685_v40, %v3003_v28  ;;  %v708_v44 = vpop.f32.mrb[27].mxu0  ;;  %v1103_v40 = vld [vmem:[#allocation2 + $0x290] sm:$0xff] }
 0x2ec   : > { %v709_v45 = vadd.f32 %v3003_v28, %v708_v44  ;;  %3736 = vmatprep.mubr.f32.mxu1 %v745_v37  ;;  %4577 = vmatprep.subr.bf16.mxu0 %v5263_v35  ;;  %v1102_v37 = vld [vmem:[#allocation2 + $0x288] sm:$0xff]  ;;  %v1105_v44 = vld [vmem:[#allocation2 + $0x2a0] sm:$0xff] }
 0x2ed   : > { %3737 = vmatmul.mubr.f32.gmra.mrb[24].mxu1 %v746_v41  ;;  %v748_v30 = vmax.f32 %v714_v43, 0.0  ;;  %4579 = vmatpush3.bf16.msra.mxu0 %v5263_v35  ;;  %v5267_v41 = vpack.c.bf16 %v1102_v37, %v1101_v36 }
 0x2ee   : > { %v747_v49 = vmax.f32 %v709_v45, 0.0  ;;  %v3688_v50 = vpop.f32.mrb[28].mxu0  ;;  %v1106_v45 = vld [vmem:[#allocation2 + $0x2a8] sm:$0xff] }
 0x2ef   : > { %v724_v10 = vadd.f32 %v3688_v50, %v3003_v28  ;;  %v718_v56 = vpop.f32.mrb[29].mxu0  ;;  %4581 = vmatprep.subr.bf16.mxu1 %v5267_v41  ;;  %v1107_v50 = vld [vmem:[#allocation2 + $0x2b0] sm:$0xff] }
 0x2f0   : > { %v719_v57 = vadd.f32 %v3003_v28, %v718_v56  ;;  %3739 = vmatprep.mubr.f32.mxu1 %v747_v49  ;;  %4583 = vmatpush3.bf16.msra.mxu1 %v5267_v41  ;;  %v5274_v49 = vpack.c.bf16 %v1106_v45, %v1105_v44  ;;  %v1109_v56 = vld [vmem:[#allocation2 + $0x2c0] sm:$0xff] }
 0x2f1   : > { %3740 = vmatmul.mubr.f32.gmra.mrb[26].mxu1 %v748_v30  ;;  %v750_v2 = vmax.f32 %v724_v10, 0.0  ;;  %v1108_v30 = vld [vmem:[#allocation2 + $0x2b8] sm:$0xff] }
 0x2f2   : > { %v749_v60 = vmax.f32 %v719_v57, 0.0  ;;  %v3691_v62 = vpop.f32.mrb[30].mxu0  ;;  %v5278_v10 = vpack.c.bf16 %v1108_v30, %v1107_v50  ;;  %v1110_v57 = vld [vmem:[#allocation2 + $0x2c8] sm:$0xff] }
 0x2f3   : > { %v734_v6 = vadd.f32 %v3691_v62, %v3003_v28  ;;  %v728_v14 = vpop.f32.mrb[31].mxu0  ;;  %v1111_v62 = vld [vmem:[#allocation2 + $0x2d0] sm:$0xff] }
 0x2f4   : > { %v729_v16 = vadd.f32 %v3003_v28, %v728_v14  ;;  %3742 = vmatprep.mubr.f32.mxu1 %v749_v60  ;;  %v1104_v28 = vld [vmem:[#allocation2 + $0x298] sm:$0xff]  ;;  %5737 = vst [vmem:[#allocation5_spill] sm:$0xff] %v5278_v10  ;;  %v5282_v60 = vpack.c.bf16 %v1110_v57, %v1109_v56  ;;  %v1113_v14 = vld [vmem:[#allocation2 + $0x2e0] sm:$0xff] }
 0x2f5   : > { %3743 = vmatmul.mubr.f32.gmra.mrb[28].mxu1 %v750_v2  ;;  %v752_v23 = vmax.f32 %v734_v6, 0.0  ;;  %v5269_v43 = vpack.c.bf16 %v1104_v28, %v1103_v40  ;;  %v1112_v2 = vld [vmem:[#allocation2 + $0x2d8] sm:$0xff] }
 0x2f6   : > { %v751_v22 = vmax.f32 %v729_v16, 0.0  ;;  %5738 = vst [vmem:[#allocation6_spill] sm:$0xff] %v5282_v60  ;;  %v5286_v6 = vpack.c.bf16 %v1112_v2, %v1111_v62  ;;  %v1114_v16 = vld [vmem:[#allocation2 + $0x2e8] sm:$0xff] }
 0x2f7   : > { %4585 = vmatprep.subr.bf16.mxu1 %v5269_v43 }
 0x2f8   : > { %3745 = vmatprep.mubr.f32.mxu1 %v751_v22  ;;  %4587 = vmatpush3.bf16.msra.mxu1 %v5269_v43  ;;  %5739 = vst [vmem:[#allocation7_spill] sm:$0xff] %v5286_v6  ;;  %v5290_v22 = vpack.c.bf16 %v1114_v16, %v1113_v14 }
 0x2f9   : > { %3746 = vmatmul.mubr.f32.gmra.mrb[30].mxu1 %v752_v23  ;;  %4589 = vmatprep.subr.bf16.mxu1 %v5274_v49  ;;  %v3004_v23 = vld [vmem:[%s5699_s2 + $0x18] ss:$0 sm:$0xff] }
 0x2fa   : > { %5740 = vst [vmem:[#allocation8_spill] sm:$0xff] %v5290_v22 }
 0x2fc   : > { %4591 = vmatpush3.bf16.msra.mxu1 %v5274_v49 }
 0x2fd   : > { %4593 = vmatprep.subr.bf16.mxu1 %v5278_v10 }
 0x300   : > { %4595 = vmatpush3.bf16.msra.mxu1 %v5278_v10 }
 0x301   : > { %4597 = vmatprep.subr.bf16.mxu1 %v5282_v60 }
 0x304   : > { %4599 = vmatpush3.bf16.msra.mxu1 %v5282_v60 }
 0x305   : > { %4601 = vmatprep.subr.bf16.mxu1 %v5286_v6 }
 0x308   : > { %4603 = vmatpush3.bf16.msra.mxu1 %v5286_v6 }
 0x309   : > { %4605 = vmatprep.subr.bf16.mxu1 %v5290_v22 }
 0x30c   : > { %4607 = vmatpush3.bf16.msra.mxu1 %v5290_v22 }
 0x3b0   : > { %v3726_v31 = vpop.f32.mrb[16].mxu1 }
 0x3b1   : > { %v840_v34 = vpop.f32.mrb[17].mxu1  ;;  %v846_v37 = vadd.f32 %v3726_v31, %v3004_v23 }
 0x3b2   : > { %v841_v36 = vadd.f32 %v3004_v23, %v840_v34 }
 0x3b4   : > { %v3729_v40 = vpop.f32.mrb[18].mxu1  ;;  %3780 = vmatprep.mubr.f32.mxu0 %v841_v36 }
 0x3b5   : > { %v850_v28 = vpop.f32.mrb[19].mxu1  ;;  %3781 = vmatmul.mubr.f32.vlgmr.msra.gmra.mrb[32].mxu0 %v846_v37  ;;  %v856_v45 = vadd.f32 %v3729_v40, %v3004_v23 }
 0x3b6   : > { %v851_v44 = vadd.f32 %v3004_v23, %v850_v28 }
 0x3b8   : > { %v3732_v50 = vpop.f32.mrb[20].mxu1  ;;  %3783 = vmatprep.mubr.f32.mxu0 %v851_v44 }
 0x3b9   : > { %v860_v30 = vpop.f32.mrb[21].mxu1  ;;  %3784 = vmatmul.mubr.f32.gmra.mrb[34].mxu0 %v856_v45  ;;  %v866_v57 = vadd.f32 %v3732_v50, %v3004_v23 }
 0x3ba   : > { %v861_v56 = vadd.f32 %v3004_v23, %v860_v30 }
 0x3bc   : > { %v3735_v62 = vpop.f32.mrb[22].mxu1  ;;  %3786 = vmatprep.mubr.f32.mxu0 %v861_v56 }
 0x3bd   : > { %v870_v2 = vpop.f32.mrb[23].mxu1  ;;  %3787 = vmatmul.mubr.f32.gmra.mrb[36].mxu0 %v866_v57  ;;  %v876_v16 = vadd.f32 %v3735_v62, %v3004_v23 }
 0x3be   : > { %v871_v14 = vadd.f32 %v3004_v23, %v870_v2 }
 0x3c0   : > { %v3738_v34 = vpop.f32.mrb[24].mxu1  ;;  %3789 = vmatprep.mubr.f32.mxu0 %v871_v14 }
 0x3c1   : > { %v880_v31 = vpop.f32.mrb[25].mxu1  ;;  %3790 = vmatmul.mubr.f32.gmra.mrb[38].mxu0 %v876_v16  ;;  %v886_v37 = vadd.f32 %v3738_v34, %v3004_v23  ;;  %v1115_v34 = vld [vmem:[#allocation2 + $0x2f0] sm:$0xff] }
 0x3c2   : > { %v881_v36 = vadd.f32 %v3004_v23, %v880_v31  ;;  %v1116_v31 = vld [vmem:[#allocation2 + $0x2f8] sm:$0xff] }
 0x3c4   : > { %v3741_v28 = vpop.f32.mrb[26].mxu1  ;;  %3792 = vmatprep.mubr.f32.mxu0 %v881_v36  ;;  %v5298_v36 = vpack.c.bf16 %v1116_v31, %v1115_v34  ;;  %v1293_v31 = vld [vmem:[#allocation2 + $0x350] sm:$0xff] }
 0x3c5   : > { %v890_v40 = vpop.f32.mrb[27].mxu1  ;;  %3793 = vmatmul.mubr.f32.gmra.mrb[40].mxu0 %v886_v37  ;;  %v896_v45 = vadd.f32 %v3741_v28, %v3004_v23  ;;  %v1283_v37 = vld [vmem:[#allocation2 + $0x300] sm:$0xff]  ;;  %v1284_v28 = vld [vmem:[#allocation2 + $0x308] sm:$0xff] }
 0x3c6   : > { %v891_v44 = vadd.f32 %v3004_v23, %v890_v40  ;;  %5741 = vst [vmem:[#allocation9_spill] sm:$0xff] %v5298_v36  ;;  %4609 = vmatprep.subr.bf16.mxu1 %v5298_v36  ;;  %v1285_v40 = vld [vmem:[#allocation2 + $0x310] sm:$0xff] }
 0x3c7   : > { %4611 = vmatpush3.bf16.msra.mxu1 %v5298_v36 }
 0x3c8   : > { %v3744_v30 = vpop.f32.mrb[28].mxu1  ;;  %3795 = vmatprep.mubr.f32.mxu0 %v891_v44  ;;  %v5302_v44 = vpack.c.bf16 %v1284_v28, %v1283_v37  ;;  %v1294_v37 = vld [vmem:[#allocation2 + $0x358] sm:$0xff] }
 0x3c9   : > { %v900_v50 = vpop.f32.mrb[29].mxu1  ;;  %3796 = vmatmul.mubr.f32.gmra.mrb[42].mxu0 %v896_v45  ;;  %v906_v57 = vadd.f32 %v3744_v30, %v3004_v23  ;;  %v1286_v45 = vld [vmem:[#allocation2 + $0x318] sm:$0xff]  ;;  %v5321_v28 = vpack.c.bf16 %v1294_v37, %v1293_v31 }
 0x3ca   : > { %v901_v56 = vadd.f32 %v3004_v23, %v900_v50  ;;  %v5304_v30 = vpack.c.bf16 %v1286_v45, %v1285_v40  ;;  %v1287_v50 = vld [vmem:[#allocation2 + $0x320] sm:$0xff]  ;;  %4613 = vmatprep.subr.bf16.mxu0 %v5302_v44  ;;  %v1296_v45 = vld [vmem:[#allocation2 + $0x368] sm:$0xff] }
 0x3cb   : > { %4615 = vmatpush3.bf16.msra.mxu0 %v5302_v44  ;;  %5746 = vst [vmem:[#allocation14_spill] sm:$0xff] %v5321_v28  ;;  %v1295_v40 = vld [vmem:[#allocation2 + $0x360] sm:$0xff] }
 0x3cc   : > { %v3747_v2 = vpop.f32.mrb[30].mxu1  ;;  %3798 = vmatprep.mubr.f32.mxu0 %v901_v56  ;;  %5742 = vst [vmem:[#allocation10_spill] sm:$0xff] %v5304_v30  ;;  %4617 = vmatprep.subr.bf16.mxu0 %v5304_v30 }
 0x3cd   : > { %v910_v62 = vpop.f32.mrb[31].mxu1  ;;  %3799 = vmatmul.mubr.f32.gmra.mrb[44].mxu0 %v906_v57  ;;  %v916_v16 = vadd.f32 %v3747_v2, %v3004_v23  ;;  %v1289_v57 = vld [vmem:[#allocation2 + $0x330] sm:$0xff]  ;;  %v1290_v2 = vld [vmem:[#allocation2 + $0x338] sm:$0xff] }
 0x3ce   : > { %v911_v14 = vadd.f32 %v3004_v23, %v910_v62  ;;  %v1288_v23 = vld [vmem:[#allocation2 + $0x328] sm:$0xff]  ;;  %v5313_v62 = vpack.c.bf16 %v1290_v2, %v1289_v57 }
 0x3cf   : > { %v5309_v56 = vpack.c.bf16 %v1288_v23, %v1287_v50  ;;  %4619 = vmatpush3.bf16.msra.mxu0 %v5304_v30  ;;  %v5325_v50 = vpack.c.bf16 %v1296_v45, %v1295_v40  ;;  %v3005_v23 = vld [vmem:[%s5699_s2 + $0x20] ss:$0 sm:$0xff] }
 0x3d0   : > { %3801 = vmatprep.mubr.f32.mxu0 %v911_v14  ;;  %5744 = vst [vmem:[#allocation12_spill] sm:$0xff] %v5313_v62  ;;  %v1291_v14 = vld [vmem:[#allocation2 + $0x340] sm:$0xff] }
 0x3d1   : > { %3802 = vmatmul.mubr.f32.gmra.mrb[46].mxu0 %v916_v16  ;;  %5743 = vst [vmem:[#allocation11_spill] sm:$0xff] %v5309_v56  ;;  %4621 = vmatprep.subr.bf16.mxu0 %v5309_v56  ;;  %v1292_v16 = vld [vmem:[#allocation2 + $0x348] sm:$0xff]  ;;  %5747 = vst [vmem:[#allocation15_spill] sm:$0xff] %v5325_v50 }
 0x3d2   : > { %v5317_v34 = vpack.c.bf16 %v1292_v16, %v1291_v14 }
 0x3d3   : > { %4623 = vmatpush3.bf16.msra.mxu0 %v5309_v56 }
 0x3d4   : > { %4625 = vmatprep.subr.bf16.mxu0 %v5313_v62  ;;  %5745 = vst [vmem:[#allocation13_spill] sm:$0xff] %v5317_v34 }
 0x3d7   : > { %4627 = vmatpush3.bf16.msra.mxu0 %v5313_v62 }
 0x3d8   : > { %4629 = vmatprep.subr.bf16.mxu0 %v5317_v34 }
 0x3db   : > { %4631 = vmatpush3.bf16.msra.mxu0 %v5317_v34 }
 0x3dc   : > { %4633 = vmatprep.subr.bf16.mxu0 %v5321_v28 }
 0x3df   : > { %4635 = vmatpush3.bf16.msra.mxu0 %v5321_v28 }
 0x3e0   : > { %4637 = vmatprep.subr.bf16.mxu0 %v5325_v50 }
 0x3e3   : > { %4639 = vmatpush3.bf16.msra.mxu0 %v5325_v50 }
 0x488   : > { %v3782_v57 = vpop.f32.mrb[32].mxu0 }
 0x489   : > { %v1012_v2 = vadd.f32 %v3782_v57, %v3005_v23  ;;  %v1006_v14 = vpop.f32.mrb[33].mxu0 }
 0x48a   : > { %v1007_v16 = vadd.f32 %v3005_v23, %v1006_v14 }
 0x48b   : > { %v1086_v34 = vmax.f32 %v1012_v2, 0.0 }
 0x48c   : > { %v1085_v31 = vmax.f32 %v1007_v16, 0.0  ;;  %v3785_v37 = vpop.f32.mrb[34].mxu0 }
 0x48d   : > { %v1022_v62 = vadd.f32 %v3785_v37, %v3005_v23  ;;  %v1016_v40 = vpop.f32.mrb[35].mxu0 }
 0x48e   : > { %v1017_v45 = vadd.f32 %v3005_v23, %v1016_v40  ;;  %3836 = vmatprep.mubr.f32.mxu1 %v1085_v31 }
 0x48f   : > { %3837 = vmatmul.mubr.f32.vlgmr.msra.gmra.mrb[32].mxu1 %v1086_v34  ;;  %v1088_v30 = vmax.f32 %v1022_v62, 0.0 }
 0x490   : > { %v1087_v28 = vmax.f32 %v1017_v45, 0.0  ;;  %v3788_v56 = vpop.f32.mrb[36].mxu0 }
 0x491   : > { %v1032_v50 = vadd.f32 %v3788_v56, %v3005_v23  ;;  %v1026_v36 = vpop.f32.mrb[37].mxu0 }
 0x492   : > { %v1027_v22 = vadd.f32 %v3005_v23, %v1026_v36  ;;  %3839 = vmatprep.mubr.f32.mxu1 %v1087_v28 }
 0x493   : > { %3840 = vmatmul.mubr.f32.gmra.mrb[34].mxu1 %v1088_v30  ;;  %v1090_v60 = vmax.f32 %v1032_v50, 0.0 }
 0x494   : > { %v1089_v6 = vmax.f32 %v1027_v22, 0.0  ;;  %v3791_v57 = vpop.f32.mrb[38].mxu0 }
 0x495   : > { %v1042_v14 = vadd.f32 %v3791_v57, %v3005_v23  ;;  %v1036_v16 = vpop.f32.mrb[39].mxu0 }
 0x496   : > { %v1037_v10 = vadd.f32 %v3005_v23, %v1036_v16  ;;  %3842 = vmatprep.mubr.f32.mxu1 %v1089_v6 }
 0x497   : > { %3843 = vmatmul.mubr.f32.gmra.mrb[36].mxu1 %v1090_v60  ;;  %v1092_v31 = vmax.f32 %v1042_v14, 0.0 }
 0x498   : > { %v1091_v2 = vmax.f32 %v1037_v10, 0.0  ;;  %v3794_v37 = vpop.f32.mrb[40].mxu0 }
 0x499   : > { %v1052_v34 = vadd.f32 %v3794_v37, %v3005_v23  ;;  %v1046_v40 = vpop.f32.mrb[41].mxu0 }
 0x49a   : > { %v1047_v45 = vadd.f32 %v3005_v23, %v1046_v40  ;;  %3845 = vmatprep.mubr.f32.mxu1 %v1091_v2 }
 0x49b   : > { %3846 = vmatmul.mubr.f32.gmra.mrb[38].mxu1 %v1092_v31  ;;  %v1094_v62 = vmax.f32 %v1052_v34, 0.0 }
 0x49c   : > { %v1093_v56 = vmax.f32 %v1047_v45, 0.0  ;;  %v3797_v36 = vpop.f32.mrb[42].mxu0 }
 0x49d   : > { %v1062_v30 = vadd.f32 %v3797_v36, %v3005_v23  ;;  %v1056_v22 = vpop.f32.mrb[43].mxu0 }
 0x49e   : > { %v1057_v28 = vadd.f32 %v3005_v23, %v1056_v22  ;;  %3848 = vmatprep.mubr.f32.mxu1 %v1093_v56  ;;  %v1297_v56 = vld [vmem:[#allocation2 + $0x370] sm:$0xff]  ;;  %v1465_v22 = vld [vmem:[#allocation2 + $0x380] sm:$0xff] }
 0x49f   : > { %3849 = vmatmul.mubr.f32.gmra.mrb[40].mxu1 %v1094_v62  ;;  %v1096_v6 = vmax.f32 %v1062_v30, 0.0  ;;  %v1298_v62 = vld [vmem:[#allocation2 + $0x378] sm:$0xff] }
 0x4a0   : > { %v1095_v50 = vmax.f32 %v1057_v28, 0.0  ;;  %v3800_v57 = vpop.f32.mrb[44].mxu0  ;;  %v5333_v30 = vpack.c.bf16 %v1298_v62, %v1297_v56  ;;  %v1466_v28 = vld [vmem:[#allocation2 + $0x388] sm:$0xff]  ;;  %v1477_v62 = vld [vmem:[#allocation2 + $0x3e0] sm:$0xff] }
 0x4a1   : > { %v1072_v60 = vadd.f32 %v3800_v57, %v3005_v23  ;;  %v1066_v10 = vpop.f32.mrb[45].mxu0  ;;  %v1468_v57 = vld [vmem:[#allocation2 + $0x398] sm:$0xff] }
 0x4a2   : > { %v1067_v16 = vadd.f32 %v3005_v23, %v1066_v10  ;;  %3851 = vmatprep.mubr.f32.mxu1 %v1095_v50  ;;  %4641 = vmatprep.subr.bf16.mxu0 %v5333_v30  ;;  %v1467_v50 = vld [vmem:[#allocation2 + $0x390] sm:$0xff]  ;;  %v1470_v10 = vld [vmem:[#allocation2 + $0x3a8] sm:$0xff] }
 0x4a3   : > { %3852 = vmatmul.mubr.f32.gmra.mrb[42].mxu1 %v1096_v6  ;;  %v1098_v2 = vmax.f32 %v1072_v60, 0.0  ;;  %4643 = vmatpush3.bf16.msra.mxu0 %v5333_v30  ;;  %v5340_v6 = vpack.c.bf16 %v1468_v57, %v1467_v50  ;;  %v1469_v60 = vld [vmem:[#allocation2 + $0x3a0] sm:$0xff]  ;;  %v5369_v50 = vld [vmem:[%s5699_s2 + $0x28] ss:$0 sm:$0xff] }
 0x4a4   : > { %v1097_v14 = vmax.f32 %v1067_v16, 0.0  ;;  %v3803_v37 = vpop.f32.mrb[46].mxu0  ;;  %4677 = vmatprep.subr.bf16.mxu0 %v5077_v3  ;;  %v5345_v16 = vpack.c.bf16 %v1470_v10, %v1469_v60 }
 0x4a5   : > { %v1082_v31 = vadd.f32 %v3803_v37, %v3005_v23  ;;  %v1076_v40 = vpop.f32.mrb[47].mxu0  ;;  %v1472_v37 = vld [vmem:[#allocation2 + $0x3b8] sm:$0xff] }
 0x4a6   : > { %v1077_v45 = vadd.f32 %v3005_v23, %v1076_v40  ;;  %3854 = vmatprep.mubr.f32.mxu1 %v1097_v14  ;;  %v5338_v23 = vpack.c.bf16 %v1466_v28, %v1465_v22  ;;  %v1471_v14 = vld [vmem:[#allocation2 + $0x3b0] sm:$0xff]  ;;  %v1474_v40 = vld [vmem:[#allocation2 + $0x3c8] sm:$0xff] }
 0x4a7   : > { %3855 = vmatmul.mubr.f32.gmra.mrb[44].mxu1 %v1098_v2  ;;  %v1100_v36 = vmax.f32 %v1082_v31, 0.0  ;;  %v5349_v2 = vpack.c.bf16 %v1472_v37, %v1471_v14  ;;  %v1473_v31 = vld [vmem:[#allocation2 + $0x3c0] sm:$0xff]  ;;  %v1478_v22 = vld [vmem:[#allocation2 + $0x3e8] sm:$0xff] }
 0x4a8   : > { %v1099_v34 = vmax.f32 %v1077_v45, 0.0  ;;  %4645 = vmatprep.subr.bf16.mxu1 %v5338_v23  ;;  %v5353_v45 = vpack.c.bf16 %v1474_v40, %v1473_v31  ;;  %v5361_v28 = vpack.c.bf16 %v1478_v22, %v1477_v62 }
 0x4a9   : > { %4647 = vmatpush3.bf16.msra.mxu1 %v5338_v23 }
 0x4aa   : > { %3857 = vmatprep.mubr.f32.mxu1 %v1099_v34  ;;  %4649 = vmatprep.subr.bf16.mxu1 %v5340_v6  ;;  %5748 = vst [vmem:[#allocation16_spill] sm:$0xff] %v5353_v45  ;;  %v1475_v34 = vld [vmem:[#allocation2 + $0x3d0] sm:$0xff]  ;;  %5750 = vst [vmem:[#allocation18_spill] sm:$0xff] %v5361_v28 }
 0x4ab   : > { %3858 = vmatmul.mubr.f32.gmra.mrb[46].mxu1 %v1100_v36  ;;  %v1476_v36 = vld [vmem:[#allocation2 + $0x3d8] sm:$0xff] }
 0x4ac   : > { %v5357_v56 = vpack.c.bf16 %v1476_v36, %v1475_v34 }
 0x4ad   : > { %4651 = vmatpush3.bf16.msra.mxu1 %v5340_v6 }
 0x4ae   : > { %4653 = vmatprep.subr.bf16.mxu1 %v5345_v16  ;;  %5749 = vst [vmem:[#allocation17_spill] sm:$0xff] %v5357_v56 }
 0x4b1   : > { %4655 = vmatpush3.bf16.msra.mxu1 %v5345_v16 }
 0x4b2   : > { %4657 = vmatprep.subr.bf16.mxu1 %v5349_v2 }
 0x4b5   : > { %4659 = vmatpush3.bf16.msra.mxu1 %v5349_v2 }
 0x4b6   : > { %4661 = vmatprep.subr.bf16.mxu1 %v5353_v45 }
 0x4b9   : > { %4663 = vmatpush3.bf16.msra.mxu1 %v5353_v45 }
 0x4ba   : > { %4665 = vmatprep.subr.bf16.mxu1 %v5357_v56 }
 0x4bd   : > { %4667 = vmatpush3.bf16.msra.mxu1 %v5357_v56 }
 0x4be   : > { %4669 = vmatprep.subr.bf16.mxu1 %v5361_v28 }
 0x4c1   : > { %4671 = vmatpush3.bf16.msra.mxu1 %v5361_v28 }
 0x562   : > { %v3838_v57 = vpop.f32.mrb[32].mxu1 }
 0x563   : > { %v1194_v60 = vadd.f32 %v3838_v57, %v5369_v50  ;;  %v1188_v10 = vpop.f32.mrb[33].mxu1 }
 0x564   : > { %v1189_v14 = vadd.f32 %v5369_v50, %v1188_v10 }
 0x565   : > { %v1268_v40 = vmax.f32 %v1194_v60, 0.0 }
 0x566   : > { %v1267_v37 = vmax.f32 %v1189_v14, 0.0  ;;  %v3841_v31 = vpop.f32.mrb[34].mxu1 }
 0x567   : > { %v1204_v34 = vadd.f32 %v3841_v31, %v5369_v50  ;;  %v1198_v36 = vpop.f32.mrb[35].mxu1 }
 0x568   : > { %v1199_v62 = vadd.f32 %v5369_v50, %v1198_v36  ;;  %3892 = vmatprep.mubr.f32.mxu0 %v1267_v37 }
 0x569   : > { %3893 = vmatmul.mubr.f32.vlgmr.msra.gmra.mrb[48].mxu0 %v1268_v40  ;;  %v1270_v56 = vmax.f32 %v1204_v34, 0.0 }
 0x56a   : > { %v1269_v22 = vmax.f32 %v1199_v62, 0.0  ;;  %v3844_v28 = vpop.f32.mrb[36].mxu1  ;;  %4679 = vmatpush3.bf16.msra.mxu0 %v5077_v3 }
 0x56b   : > { %v1214_v57 = vadd.f32 %v3844_v28, %v5369_v50  ;;  %v1208_v45 = vpop.f32.mrb[37].mxu1  ;;  %4681 = vmatprep.subr.bf16.mxu0 %v5079_v5 }
 0x56c   : > { %v1209_v10 = vadd.f32 %v5369_v50, %v1208_v45  ;;  %3895 = vmatprep.mubr.f32.mxu0 %v1269_v22 }
 0x56d   : > { %3896 = vmatmul.mubr.f32.gmra.mrb[50].mxu0 %v1270_v56  ;;  %v1272_v37 = vmax.f32 %v1214_v57, 0.0 }
 0x56e   : > { %v1271_v60 = vmax.f32 %v1209_v10, 0.0  ;;  %v3847_v14 = vpop.f32.mrb[38].mxu1  ;;  %4683 = vmatpush3.bf16.msra.mxu0 %v5079_v5 }
 0x56f   : > { %v1224_v31 = vadd.f32 %v3847_v14, %v5369_v50  ;;  %v1218_v40 = vpop.f32.mrb[39].mxu1  ;;  %4685 = vmatprep.subr.bf16.mxu0 %v5089_v8 }
 0x570   : > { %v1219_v3 = vadd.f32 %v5369_v50, %v1218_v40  ;;  %3898 = vmatprep.mubr.f32.mxu0 %v1271_v60 }
 0x571   : > { %3899 = vmatmul.mubr.f32.gmra.mrb[52].mxu0 %v1272_v37  ;;  %v1274_v45 = vmax.f32 %v1224_v31, 0.0 }
 0x572   : > { %v1273_v28 = vmax.f32 %v1219_v3, 0.0  ;;  %v3850_v34 = vpop.f32.mrb[40].mxu1  ;;  %4687 = vmatpush3.bf16.msra.mxu0 %v5089_v8 }
 0x573   : > { %v1234_v56 = vadd.f32 %v3850_v34, %v5369_v50  ;;  %v1228_v36 = vpop.f32.mrb[41].mxu1  ;;  %4689 = vmatprep.subr.bf16.mxu0 %v5094_v12 }
 0x574   : > { %v1229_v5 = vadd.f32 %v5369_v50, %v1228_v36  ;;  %3901 = vmatprep.mubr.f32.mxu0 %v1273_v28 }
 0x575   : > { %3902 = vmatmul.mubr.f32.gmra.mrb[54].mxu0 %v1274_v45  ;;  %v1276_v57 = vmax.f32 %v1234_v56, 0.0 }
 0x576   : > { %v1275_v62 = vmax.f32 %v1229_v5, 0.0  ;;  %v3853_v22 = vpop.f32.mrb[42].mxu1  ;;  %4691 = vmatpush3.bf16.msra.mxu0 %v5094_v12 }
 0x577   : > { %v1244_v10 = vadd.f32 %v3853_v22, %v5369_v50  ;;  %v1238_v60 = vpop.f32.mrb[43].mxu1  ;;  %4693 = vmatprep.subr.bf16.mxu0 %v5102_v21  ;;  %v1480_v22 = vld [vmem:[#allocation2 + $0x3f8] sm:$0xff] }
 0x578   : > { %v1239_v8 = vadd.f32 %v5369_v50, %v1238_v60  ;;  %3904 = vmatprep.mubr.f32.mxu0 %v1275_v62 }
 0x579   : > { %3905 = vmatmul.mubr.f32.gmra.mrb[56].mxu0 %v1276_v57  ;;  %v1278_v31 = vmax.f32 %v1244_v10, 0.0 }
 0x57a   : > { %v1277_v14 = vmax.f32 %v1239_v8, 0.0  ;;  %v3856_v37 = vpop.f32.mrb[44].mxu1  ;;  %4695 = vmatpush3.bf16.msra.mxu0 %v5102_v21 }
 0x57b   : > { %v1254_v40 = vadd.f32 %v3856_v37, %v5369_v50  ;;  %v1248_v3 = vpop.f32.mrb[45].mxu1  ;;  %4697 = vmatprep.subr.bf16.mxu0 %v5111_v27 }
 0x57c   : > { %v1249_v12 = vadd.f32 %v5369_v50, %v1248_v3  ;;  %3907 = vmatprep.mubr.f32.mxu0 %v1277_v14 }
 0x57d   : > { %3908 = vmatmul.mubr.f32.gmra.mrb[58].mxu0 %v1278_v31  ;;  %v1280_v45 = vmax.f32 %v1254_v40, 0.0 }
 0x57e   : > { %v1279_v28 = vmax.f32 %v1249_v12, 0.0  ;;  %v3859_v34 = vpop.f32.mrb[46].mxu1  ;;  %4699 = vmatpush3.bf16.msra.mxu0 %v5111_v27  ;;  %v1479_v27 = vld [vmem:[#allocation2 + $0x3f0] sm:$0xff] }
 0x57f   : > { %v1264_v56 = vadd.f32 %v3859_v34, %v5369_v50  ;;  %v1258_v36 = vpop.f32.mrb[47].mxu1  ;;  %4701 = vmatprep.subr.bf16.mxu0 %v5119_v33  ;;  %v5403_v57 = vpack.c.bf16 %v1480_v22, %v1479_v27 }
 0x580   : > { %v1259_v21 = vadd.f32 %v5369_v50, %v1258_v36  ;;  %3910 = vmatprep.mubr.f32.mxu0 %v1279_v28 }
 0x581   : > { %3911 = vmatmul.mubr.f32.gmra.mrb[60].mxu0 %v1280_v45  ;;  %v1282_v62 = vmax.f32 %v1264_v56, 0.0  ;;  %4673 = vmatprep.subr.bf16.mxu1 %v5403_v57 }
 0x582   : > { %v1281_v5 = vmax.f32 %v1259_v21, 0.0  ;;  %4703 = vmatpush3.bf16.msra.mxu0 %v5119_v33  ;;  %4675 = vmatpush3.bf16.msra.mxu1 %v5403_v57  ;;  %v5411_v33 = vld [vmem:[%s5699_s2 + $0x30] ss:$0 sm:$0xff] }
 0x583   : > { %4705 = vmatprep.subr.bf16.mxu0 %v5127_v39  ;;  %4709 = vmatprep.subr.bf16.mxu1 %v5097_v19 }
 0x584   : > { %3913 = vmatprep.mubr.f32.mxu0 %v1281_v5 }
 0x585   : > { %3914 = vmatmul.mubr.f32.gmra.mrb[62].mxu0 %v1282_v62 }
 0x586   : > { %4707 = vmatpush3.bf16.msra.mxu0 %v5127_v39 }
 0x587   : > { %4741 = vmatprep.subr.bf16.mxu0 %v5162_v4 }
 0x63c   : > { %v3894_v50 = vpop.f32.mrb[48].mxu0 }
 0x63d   : > { %v1376_v39 = vadd.f32 %v3894_v50, %v5411_v33  ;;  %v1370_v10 = vpop.f32.mrb[49].mxu0 }
 0x63e   : > { %v1371_v60 = vadd.f32 %v5411_v33, %v1370_v10 }
 0x63f   : > { %v1450_v37 = vmax.f32 %v1376_v39, 0.0 }
 0x640   : > { %v1449_v8 = vmax.f32 %v1371_v60, 0.0  ;;  %v3897_v14 = vpop.f32.mrb[50].mxu0 }
 0x641   : > { %v1386_v31 = vadd.f32 %v3897_v14, %v5411_v33  ;;  %v1380_v40 = vpop.f32.mrb[51].mxu0 }
 0x642   : > { %v1381_v3 = vadd.f32 %v5411_v33, %v1380_v40  ;;  %3948 = vmatprep.mubr.f32.mxu1 %v1449_v8 }
 0x643   : > { %3949 = vmatmul.mubr.f32.vlgmr.msra.gmra.mrb[48].mxu1 %v1450_v37  ;;  %v1452_v34 = vmax.f32 %v1386_v31, 0.0 }
 0x644   : > { %v1451_v12 = vmax.f32 %v1381_v3, 0.0  ;;  %v3900_v28 = vpop.f32.mrb[52].mxu0  ;;  %4711 = vmatpush3.bf16.msra.mxu1 %v5097_v19 }
 0x645   : > { %v1396_v45 = vadd.f32 %v3900_v28, %v5411_v33  ;;  %v1390_v56 = vpop.f32.mrb[53].mxu0  ;;  %4713 = vmatprep.subr.bf16.mxu1 %v5099_v20 }
 0x646   : > { %v1391_v36 = vadd.f32 %v5411_v33, %v1390_v56  ;;  %3951 = vmatprep.mubr.f32.mxu1 %v1451_v12 }
 0x647   : > { %3952 = vmatmul.mubr.f32.gmra.mrb[50].mxu1 %v1452_v34  ;;  %v1454_v62 = vmax.f32 %v1396_v45, 0.0 }
 0x648   : > { %v1453_v21 = vmax.f32 %v1391_v36, 0.0  ;;  %v3903_v5 = vpop.f32.mrb[54].mxu0  ;;  %4715 = vmatpush3.bf16.msra.mxu1 %v5099_v20 }
 0x649   : > { %v1406_v27 = vadd.f32 %v3903_v5, %v5411_v33  ;;  %v1400_v22 = vpop.f32.mrb[55].mxu0  ;;  %4717 = vmatprep.subr.bf16.mxu1 %v5108_v26 }
 0x64a   : > { %v1401_v19 = vadd.f32 %v5411_v33, %v1400_v22  ;;  %3954 = vmatprep.mubr.f32.mxu1 %v1453_v21 }
 0x64b   : > { %3955 = vmatmul.mubr.f32.gmra.mrb[52].mxu1 %v1454_v62  ;;  %v1456_v10 = vmax.f32 %v1406_v27, 0.0 }
 0x64c   : > { %v1455_v50 = vmax.f32 %v1401_v19, 0.0  ;;  %v3906_v39 = vpop.f32.mrb[56].mxu0  ;;  %4719 = vmatpush3.bf16.msra.mxu1 %v5108_v26 }
 0x64d   : > { %v1416_v60 = vadd.f32 %v3906_v39, %v5411_v33  ;;  %v1410_v8 = vpop.f32.mrb[57].mxu0  ;;  %4721 = vmatprep.subr.bf16.mxu1 %v5116_v32 }
 0x64e   : > { %v1411_v20 = vadd.f32 %v5411_v33, %v1410_v8  ;;  %3957 = vmatprep.mubr.f32.mxu1 %v1455_v50 }
 0x64f   : > { %3958 = vmatmul.mubr.f32.gmra.mrb[54].mxu1 %v1456_v10  ;;  %v1458_v31 = vmax.f32 %v1416_v60, 0.0 }
 0x650   : > { %v1457_v14 = vmax.f32 %v1411_v20, 0.0  ;;  %v3909_v37 = vpop.f32.mrb[58].mxu0  ;;  %4723 = vmatpush3.bf16.msra.mxu1 %v5116_v32 }
 0x651   : > { %v1426_v40 = vadd.f32 %v3909_v37, %v5411_v33  ;;  %v1420_v3 = vpop.f32.mrb[59].mxu0  ;;  %4725 = vmatprep.subr.bf16.mxu1 %v5124_v38 }
 0x652   : > { %v1421_v26 = vadd.f32 %v5411_v33, %v1420_v3  ;;  %3960 = vmatprep.mubr.f32.mxu1 %v1457_v14 }
 0x653   : > { %3961 = vmatmul.mubr.f32.gmra.mrb[56].mxu1 %v1458_v31  ;;  %v1460_v34 = vmax.f32 %v1426_v40, 0.0 }
 0x654   : > { %v1459_v12 = vmax.f32 %v1421_v26, 0.0  ;;  %v3912_v28 = vpop.f32.mrb[60].mxu0  ;;  %4727 = vmatpush3.bf16.msra.mxu1 %v5124_v38 }
 0x655   : > { %v1436_v45 = vadd.f32 %v3912_v28, %v5411_v33  ;;  %v1430_v56 = vpop.f32.mrb[61].mxu0  ;;  %4729 = vmatprep.subr.bf16.mxu1 %v5132_v42 }
 0x656   : > { %v1431_v32 = vadd.f32 %v5411_v33, %v1430_v56  ;;  %3963 = vmatprep.mubr.f32.mxu1 %v1459_v12 }
 0x657   : > { %3964 = vmatmul.mubr.f32.gmra.mrb[58].mxu1 %v1460_v34  ;;  %v1462_v5 = vmax.f32 %v1436_v45, 0.0 }
 0x658   : > { %v1461_v36 = vmax.f32 %v1431_v32, 0.0  ;;  %v3915_v21 = vpop.f32.mrb[62].mxu0  ;;  %4731 = vmatpush3.bf16.msra.mxu1 %v5132_v42  ;;  %v5449_v42 = vld [vmem:[%s5699_s2 + $0x38] ss:$0 sm:$0xff] }
 0x659   : > { %v1446_v62 = vadd.f32 %v3915_v21, %v5411_v33  ;;  %v1440_v27 = vpop.f32.mrb[63].mxu0  ;;  %4733 = vmatprep.subr.bf16.mxu1 %v5139_v46 }
 0x65a   : > { %v1441_v38 = vadd.f32 %v5411_v33, %v1440_v27  ;;  %3966 = vmatprep.mubr.f32.mxu1 %v1461_v36 }
 0x65b   : > { %3967 = vmatmul.mubr.f32.gmra.mrb[60].mxu1 %v1462_v5  ;;  %v1464_v19 = vmax.f32 %v1446_v62, 0.0 }
 0x65c   : > { %v1463_v22 = vmax.f32 %v1441_v38, 0.0  ;;  %4735 = vmatpush3.bf16.msra.mxu1 %v5139_v46 }
 0x65d   : > { %4737 = vmatprep.subr.bf16.mxu1 %v5158_v63 }
 0x65e   : > { %3969 = vmatprep.mubr.f32.mxu1 %v1463_v22  ;;  %v5507_v22 = vld [vmem:[%s5699_s2] ss:$0 sm:$0xff] }
 0x65f   : > { %3970 = vmatmul.mubr.f32.gmra.mrb[62].mxu1 %v1464_v19 }
 0x660   : > { %4739 = vmatpush3.bf16.msra.mxu1 %v5158_v63 }
 0x661   : > { %4773 = vmatprep.subr.bf16.mxu1 %v5197_v51 }
 0x716   : > { %v3950_v46 = vpop.f32.mrb[48].mxu1 }
 0x717   : > { %v1558_v63 = vadd.f32 %v3950_v46, %v5449_v42  ;;  %v1552_v33 = vpop.f32.mrb[49].mxu1 }
 0x718   : > { %v1553_v50 = vadd.f32 %v5449_v42, %v1552_v33 }
 0x719   : > { %2888 = vst [vmem:[%s5454_s29 + $0x10] sm:$0xff] %v1558_v63 }
 0x71a   : > { %2887 = vst [vmem:[%s5454_s29] sm:$0xff] %v1553_v50  ;;  %v3953_v39 = vpop.f32.mrb[50].mxu1  ;;  %4004 = vmatprep.mubr.f32.mxu0 %v1553_v50 }
 0x71b   : > { %v1568_v10 = vadd.f32 %v3953_v39, %v5449_v42  ;;  %v1562_v60 = vpop.f32.mrb[51].mxu1  ;;  %4005 = vmatmul.mubr.f32.vlgmr.msra.gmra.mrb[64].mxu0 %v1558_v63 }
 0x71c   : > { %v1563_v8 = vadd.f32 %v5449_v42, %v1562_v60  ;;  %4743 = vmatpush3.bf16.msra.mxu0 %v5162_v4 }
 0x71d   : > { %2890 = vst [vmem:[%s5454_s29 + $0x30] sm:$0xff] %v1568_v10  ;;  %4745 = vmatprep.subr.bf16.mxu0 %v5164_v7 }
 0x71e   : > { %2889 = vst [vmem:[%s5454_s29 + $0x20] sm:$0xff] %v1563_v8  ;;  %v3956_v20 = vpop.f32.mrb[52].mxu1  ;;  %4007 = vmatprep.mubr.f32.mxu0 %v1563_v8 }
 0x71f   : > { %v1578_v14 = vadd.f32 %v3956_v20, %v5449_v42  ;;  %v1572_v37 = vpop.f32.mrb[53].mxu1  ;;  %4008 = vmatmul.mubr.f32.gmra.mrb[66].mxu0 %v1568_v10 }
 0x720   : > { %v1573_v31 = vadd.f32 %v5449_v42, %v1572_v37  ;;  %4747 = vmatpush3.bf16.msra.mxu0 %v5164_v7 }
 0x721   : > { %2892 = vst [vmem:[%s5454_s29 + $0x50] sm:$0xff] %v1578_v14  ;;  %4749 = vmatprep.subr.bf16.mxu0 %v5169_v11 }
 0x722   : > { %2891 = vst [vmem:[%s5454_s29 + $0x40] sm:$0xff] %v1573_v31  ;;  %v3959_v4 = vpop.f32.mrb[54].mxu1  ;;  %4010 = vmatprep.mubr.f32.mxu0 %v1573_v31 }
 0x723   : > { %v1588_v40 = vadd.f32 %v3959_v4, %v5449_v42  ;;  %v1582_v3 = vpop.f32.mrb[55].mxu1  ;;  %4011 = vmatmul.mubr.f32.gmra.mrb[68].mxu0 %v1578_v14 }
 0x724   : > { %v1583_v26 = vadd.f32 %v5449_v42, %v1582_v3  ;;  %4751 = vmatpush3.bf16.msra.mxu0 %v5169_v11 }
 0x725   : > { %2894 = vst [vmem:[%s5454_s29 + $0x70] sm:$0xff] %v1588_v40  ;;  %4753 = vmatprep.subr.bf16.mxu0 %v5173_v15 }
 0x726   : > { %2893 = vst [vmem:[%s5454_s29 + $0x60] sm:$0xff] %v1583_v26  ;;  %v3962_v7 = vpop.f32.mrb[56].mxu1  ;;  %4013 = vmatprep.mubr.f32.mxu0 %v1583_v26 }
 0x727   : > { %v1598_v12 = vadd.f32 %v3962_v7, %v5449_v42  ;;  %v1592_v28 = vpop.f32.mrb[57].mxu1  ;;  %4014 = vmatmul.mubr.f32.gmra.mrb[70].mxu0 %v1588_v40 }
 0x728   : > { %v1593_v34 = vadd.f32 %v5449_v42, %v1592_v28  ;;  %4755 = vmatpush3.bf16.msra.mxu0 %v5173_v15 }
 0x729   : > { %2896 = vst [vmem:[%s5454_s29 + $0x90] sm:$0xff] %v1598_v12  ;;  %4757 = vmatprep.subr.bf16.mxu0 %v5177_v18 }
 0x72a   : > { %2895 = vst [vmem:[%s5454_s29 + $0x80] sm:$0xff] %v1593_v34  ;;  %v3965_v11 = vpop.f32.mrb[58].mxu1  ;;  %4016 = vmatprep.mubr.f32.mxu0 %v1593_v34 }
 0x72b   : > { %v1608_v45 = vadd.f32 %v3965_v11, %v5449_v42  ;;  %v1602_v56 = vpop.f32.mrb[59].mxu1  ;;  %4017 = vmatmul.mubr.f32.gmra.mrb[72].mxu0 %v1598_v12 }
 0x72c   : > { %v1603_v32 = vadd.f32 %v5449_v42, %v1602_v56  ;;  %4759 = vmatpush3.bf16.msra.mxu0 %v5177_v18 }
 0x72d   : > { %2898 = vst [vmem:[%s5454_s29 + $0xb0] sm:$0xff] %v1608_v45  ;;  %4761 = vmatprep.subr.bf16.mxu0 %v5181_v24 }
 0x72e   : > { %2897 = vst [vmem:[%s5454_s29 + $0xa0] sm:$0xff] %v1603_v32  ;;  %v3968_v15 = vpop.f32.mrb[60].mxu1  ;;  %4019 = vmatprep.mubr.f32.mxu0 %v1603_v32 }
 0x72f   : > { %v1618_v36 = vadd.f32 %v3968_v15, %v5449_v42  ;;  %v1612_v21 = vpop.f32.mrb[61].mxu1  ;;  %4020 = vmatmul.mubr.f32.gmra.mrb[74].mxu0 %v1608_v45 }
 0x730   : > { %v1613_v5 = vadd.f32 %v5449_v42, %v1612_v21  ;;  %4763 = vmatpush3.bf16.msra.mxu0 %v5181_v24 }
 0x731   : > { %2900 = vst [vmem:[%s5454_s29 + $0xd0] sm:$0xff] %v1618_v36  ;;  %4765 = vmatprep.subr.bf16.mxu0 %v5185_v29 }
 0x732   : > { %2899 = vst [vmem:[%s5454_s29 + $0xc0] sm:$0xff] %v1613_v5  ;;  %v3971_v18 = vpop.f32.mrb[62].mxu1  ;;  %4022 = vmatprep.mubr.f32.mxu0 %v1613_v5 }
 0x733   : > { %v1628_v62 = vadd.f32 %v3971_v18, %v5449_v42  ;;  %v1622_v27 = vpop.f32.mrb[63].mxu1  ;;  %4023 = vmatmul.mubr.f32.gmra.mrb[76].mxu0 %v1618_v36 }
 0x734   : > { %v1623_v38 = vadd.f32 %v5449_v42, %v1622_v27  ;;  %4767 = vmatpush3.bf16.msra.mxu0 %v5185_v29 }
 0x735   : > { %2902 = vst [vmem:[%s5454_s29 + $0xf0] sm:$0xff] %v1628_v62  ;;  %4769 = vmatprep.subr.bf16.mxu0 %v5193_v47 }
 0x736   : > { %2901 = vst [vmem:[%s5454_s29 + $0xe0] sm:$0xff] %v1623_v38  ;;  %4025 = vmatprep.mubr.f32.mxu0 %v1623_v38 }
 0x737   : > { %4026 = vmatmul.mubr.f32.gmra.mrb[78].mxu0 %v1628_v62 }
 0x738   : > { %4771 = vmatpush3.bf16.msra.mxu0 %v5193_v47 }
 0x739   : > { %4805 = vmatprep.subr.bf16.mxu0 %v5232_v53 }
 0x7ee   : > { %v4006_v24 = vpop.f32.mrb[64].mxu0 }
 0x7ef   : > { %v1703_v19 = vadd.f32 %v5507_v22, %v4006_v24  ;;  %v1697_v42 = vpop.f32.mrb[65].mxu0 }
 0x7f0   : > { %v1698_v29 = vadd.f32 %v5507_v22, %v1697_v42 }
 0x7f1   : > { %v1777_v33 = vmax.f32 %v1703_v19, 0.0 }
 0x7f2   : > { %v1776_v46 = vmax.f32 %v1698_v29, 0.0  ;;  %v4009_v63 = vpop.f32.mrb[66].mxu0 }
 0x7f3   : > { %v1713_v50 = vadd.f32 %v5507_v22, %v4009_v63  ;;  %v1707_v39 = vpop.f32.mrb[67].mxu0 }
 0x7f4   : > { %v1708_v47 = vadd.f32 %v5507_v22, %v1707_v39  ;;  %4060 = vmatprep.mubr.f32.mxu1 %v1776_v46 }
 0x7f5   : > { %4061 = vmatmul.mubr.f32.vlgmr.msra.gmra.mrb[64].mxu1 %v1777_v33  ;;  %v1779_v8 = vmax.f32 %v1713_v50, 0.0  ;;  %v5544_v33 = vld [vmem:[%s5699_s2 + $0x8] ss:$0 sm:$0xff] }
 0x7f6   : > { %v1778_v10 = vmax.f32 %v1708_v47, 0.0  ;;  %v4012_v60 = vpop.f32.mrb[68].mxu0  ;;  %4775 = vmatpush3.bf16.msra.mxu1 %v5197_v51 }
 0x7f7   : > { %v1723_v20 = vadd.f32 %v5507_v22, %v4012_v60  ;;  %v1717_v14 = vpop.f32.mrb[69].mxu0  ;;  %4777 = vmatprep.subr.bf16.mxu1 %v5199_v52 }
 0x7f8   : > { %v1718_v37 = vadd.f32 %v5507_v22, %v1717_v14  ;;  %4063 = vmatprep.mubr.f32.mxu1 %v1778_v10 }
 0x7f9   : > { %4064 = vmatmul.mubr.f32.gmra.mrb[66].mxu1 %v1779_v8  ;;  %v1781_v40 = vmax.f32 %v1723_v20, 0.0 }
 0x7fa   : > { %v1780_v31 = vmax.f32 %v1718_v37, 0.0  ;;  %v4015_v4 = vpop.f32.mrb[70].mxu0  ;;  %4779 = vmatpush3.bf16.msra.mxu1 %v5199_v52 }
 0x7fb   : > { %v1733_v3 = vadd.f32 %v5507_v22, %v4015_v4  ;;  %v1727_v26 = vpop.f32.mrb[71].mxu0  ;;  %4781 = vmatprep.subr.bf16.mxu1 %v5204_v55 }
 0x7fc   : > { %v1728_v51 = vadd.f32 %v5507_v22, %v1727_v26  ;;  %4066 = vmatprep.mubr.f32.mxu1 %v1780_v31 }
 0x7fd   : > { %4067 = vmatmul.mubr.f32.gmra.mrb[68].mxu1 %v1781_v40  ;;  %v1783_v28 = vmax.f32 %v1733_v3, 0.0 }
 0x7fe   : > { %v1782_v7 = vmax.f32 %v1728_v51, 0.0  ;;  %v4018_v12 = vpop.f32.mrb[72].mxu0  ;;  %4783 = vmatpush3.bf16.msra.mxu1 %v5204_v55 }
 0x7ff   : > { %v1743_v34 = vadd.f32 %v5507_v22, %v4018_v12  ;;  %v1737_v11 = vpop.f32.mrb[73].mxu0  ;;  %4785 = vmatprep.subr.bf16.mxu1 %v5208_v58 }
 0x800   : > { %v1738_v52 = vadd.f32 %v5507_v22, %v1737_v11  ;;  %4069 = vmatprep.mubr.f32.mxu1 %v1782_v7 }
 0x801   : > { %4070 = vmatmul.mubr.f32.gmra.mrb[70].mxu1 %v1783_v28  ;;  %v1785_v32 = vmax.f32 %v1743_v34, 0.0 }
 0x802   : > { %v1784_v45 = vmax.f32 %v1738_v52, 0.0  ;;  %v4021_v56 = vpop.f32.mrb[74].mxu0  ;;  %4787 = vmatpush3.bf16.msra.mxu1 %v5208_v58 }
 0x803   : > { %v1753_v15 = vadd.f32 %v5507_v22, %v4021_v56  ;;  %v1747_v36 = vpop.f32.mrb[75].mxu0  ;;  %4789 = vmatprep.subr.bf16.mxu1 %v5212_v61 }
 0x804   : > { %v1748_v55 = vadd.f32 %v5507_v22, %v1747_v36  ;;  %4072 = vmatprep.mubr.f32.mxu1 %v1784_v45 }
 0x805   : > { %4073 = vmatmul.mubr.f32.gmra.mrb[72].mxu1 %v1785_v32  ;;  %v1787_v18 = vmax.f32 %v1753_v15, 0.0 }
 0x806   : > { %v1786_v21 = vmax.f32 %v1748_v55, 0.0  ;;  %v4024_v5 = vpop.f32.mrb[76].mxu0  ;;  %4791 = vmatpush3.bf16.msra.mxu1 %v5212_v61 }
 0x807   : > { %v1763_v62 = vadd.f32 %v5507_v22, %v4024_v5  ;;  %v1757_v27 = vpop.f32.mrb[77].mxu0  ;;  %4793 = vmatprep.subr.bf16.mxu1 %v5216_v1 }
 0x808   : > { %v1758_v58 = vadd.f32 %v5507_v22, %v1757_v27  ;;  %4075 = vmatprep.mubr.f32.mxu1 %v1786_v21 }
 0x809   : > { %4076 = vmatmul.mubr.f32.gmra.mrb[74].mxu1 %v1787_v18  ;;  %v1789_v19 = vmax.f32 %v1763_v62, 0.0 }
 0x80a   : > { %v1788_v38 = vmax.f32 %v1758_v58, 0.0  ;;  %v4027_v24 = vpop.f32.mrb[78].mxu0  ;;  %4795 = vmatpush3.bf16.msra.mxu1 %v5216_v1 }
 0x80b   : > { %v1773_v42 = vadd.f32 %v5507_v22, %v4027_v24  ;;  %v1767_v29 = vpop.f32.mrb[79].mxu0  ;;  %4797 = vmatprep.subr.bf16.mxu1 %v5220_v9 }
 0x80c   : > { %v1768_v61 = vadd.f32 %v5507_v22, %v1767_v29  ;;  %4078 = vmatprep.mubr.f32.mxu1 %v1788_v38 }
 0x80d   : > { %4079 = vmatmul.mubr.f32.gmra.mrb[76].mxu1 %v1789_v19  ;;  %v1791_v63 = vmax.f32 %v1773_v42, 0.0 }
 0x80e   : > { %v1790_v46 = vmax.f32 %v1768_v61, 0.0  ;;  %4799 = vmatpush3.bf16.msra.mxu1 %v5220_v9 }
 0x80f   : > { %4801 = vmatprep.subr.bf16.mxu1 %v5228_v48 }
 0x810   : > { %4081 = vmatprep.mubr.f32.mxu1 %v1790_v46  ;;  %v5581_v46 = vld [vmem:[%s5699_s2 + $0x10] ss:$0 sm:$0xff] }
 0x811   : > { %4082 = vmatmul.mubr.f32.gmra.mrb[78].mxu1 %v1791_v63 }
 0x812   : > { %4803 = vmatpush3.bf16.msra.mxu1 %v5228_v48 }
 0x813   : > { %4837 = vmatprep.subr.bf16.mxu1 %v5267_v41 }
 0x8c8   : > { %v4062_v1 = vpop.f32.mrb[64].mxu1 }
 0x8c9   : > { %v1864_v22 = vadd.f32 %v5544_v33, %v4062_v1  ;;  %v1858_v50 = vpop.f32.mrb[65].mxu1 }
 0x8ca   : > { %v1859_v9 = vadd.f32 %v5544_v33, %v1858_v50 }
 0x8cb   : > { %v1938_v10 = vmax.f32 %v1864_v22, 0.0 }
 0x8cc   : > { %v1937_v39 = vmax.f32 %v1859_v9, 0.0  ;;  %v4065_v47 = vpop.f32.mrb[66].mxu1 }
 0x8cd   : > { %v1874_v60 = vadd.f32 %v5544_v33, %v4065_v47  ;;  %v1868_v8 = vpop.f32.mrb[67].mxu1 }
 0x8ce   : > { %v1869_v48 = vadd.f32 %v5544_v33, %v1868_v8  ;;  %4116 = vmatprep.mubr.f32.mxu0 %v1937_v39 }
 0x8cf   : > { %4117 = vmatmul.mubr.f32.vlgmr.msra.gmra.mrb[80].mxu0 %v1938_v10  ;;  %v1940_v37 = vmax.f32 %v1874_v60, 0.0 }
 0x8d0   : > { %v1939_v20 = vmax.f32 %v1869_v48, 0.0  ;;  %v4068_v14 = vpop.f32.mrb[68].mxu1  ;;  %4807 = vmatpush3.bf16.msra.mxu0 %v5232_v53 }
 0x8d1   : > { %v1884_v31 = vadd.f32 %v5544_v33, %v4068_v14  ;;  %v1878_v4 = vpop.f32.mrb[69].mxu1  ;;  %4809 = vmatprep.subr.bf16.mxu0 %v5234_v54 }
 0x8d2   : > { %v1879_v40 = vadd.f32 %v5544_v33, %v1878_v4  ;;  %4119 = vmatprep.mubr.f32.mxu0 %v1939_v20 }
 0x8d3   : > { %4120 = vmatmul.mubr.f32.gmra.mrb[82].mxu0 %v1940_v37  ;;  %v1942_v51 = vmax.f32 %v1884_v31, 0.0 }
 0x8d4   : > { %v1941_v3 = vmax.f32 %v1879_v40, 0.0  ;;  %v4071_v26 = vpop.f32.mrb[70].mxu1  ;;  %4811 = vmatpush3.bf16.msra.mxu0 %v5234_v54 }
 0x8d5   : > { %v1894_v7 = vadd.f32 %v5544_v33, %v4071_v26  ;;  %v1888_v12 = vpop.f32.mrb[71].mxu1  ;;  %4813 = vmatprep.subr.bf16.mxu0 %v5239_v59 }
 0x8d6   : > { %v1889_v53 = vadd.f32 %v5544_v33, %v1888_v12  ;;  %4122 = vmatprep.mubr.f32.mxu0 %v1941_v3 }
 0x8d7   : > { %4123 = vmatmul.mubr.f32.gmra.mrb[84].mxu0 %v1942_v51  ;;  %v1944_v11 = vmax.f32 %v1894_v7, 0.0 }
 0x8d8   : > { %v1943_v28 = vmax.f32 %v1889_v53, 0.0  ;;  %v4074_v34 = vpop.f32.mrb[72].mxu1  ;;  %4815 = vmatpush3.bf16.msra.mxu0 %v5239_v59  ;;  %v5751_v53 = vld [vmem:[#allocation5_spill] sm:$0xff] }
 0x8d9   : > { %v1904_v52 = vadd.f32 %v5544_v33, %v4074_v34  ;;  %v1898_v45 = vpop.f32.mrb[73].mxu1  ;;  %4817 = vmatprep.subr.bf16.mxu0 %v5243_v0 }
 0x8da   : > { %v1899_v54 = vadd.f32 %v5544_v33, %v1898_v45  ;;  %4125 = vmatprep.mubr.f32.mxu0 %v1943_v28 }
 0x8db   : > { %4126 = vmatmul.mubr.f32.gmra.mrb[86].mxu0 %v1944_v11  ;;  %v1946_v15 = vmax.f32 %v1904_v52, 0.0 }
 0x8dc   : > { %v1945_v56 = vmax.f32 %v1899_v54, 0.0  ;;  %v4077_v32 = vpop.f32.mrb[74].mxu1  ;;  %4819 = vmatpush3.bf16.msra.mxu0 %v5243_v0  ;;  %v5752_v54 = vld [vmem:[#allocation6_spill] sm:$0xff] }
 0x8dd   : > { %v1914_v36 = vadd.f32 %v5544_v33, %v4077_v32  ;;  %v1908_v55 = vpop.f32.mrb[75].mxu1  ;;  %4821 = vmatprep.subr.bf16.mxu0 %v5247_v13 }
 0x8de   : > { %v1909_v59 = vadd.f32 %v5544_v33, %v1908_v55  ;;  %4128 = vmatprep.mubr.f32.mxu0 %v1945_v56 }
 0x8df   : > { %4129 = vmatmul.mubr.f32.gmra.mrb[88].mxu0 %v1946_v15  ;;  %v1948_v18 = vmax.f32 %v1914_v36, 0.0 }
 0x8e0   : > { %v1947_v21 = vmax.f32 %v1909_v59, 0.0  ;;  %v4080_v5 = vpop.f32.mrb[76].mxu1  ;;  %4823 = vmatpush3.bf16.msra.mxu0 %v5247_v13  ;;  %v5753_v59 = vld [vmem:[#allocation7_spill] sm:$0xff] }
 0x8e1   : > { %v1924_v62 = vadd.f32 %v5544_v33, %v4080_v5  ;;  %v1918_v27 = vpop.f32.mrb[77].mxu1  ;;  %4825 = vmatprep.subr.bf16.mxu0 %v5251_v17 }
 0x8e2   : > { %v1919_v0 = vadd.f32 %v5544_v33, %v1918_v27  ;;  %4131 = vmatprep.mubr.f32.mxu0 %v1947_v21 }
 0x8e3   : > { %4132 = vmatmul.mubr.f32.gmra.mrb[90].mxu0 %v1948_v18  ;;  %v1950_v24 = vmax.f32 %v1924_v62, 0.0 }
 0x8e4   : > { %v1949_v58 = vmax.f32 %v1919_v0, 0.0  ;;  %v4083_v38 = vpop.f32.mrb[78].mxu1  ;;  %4827 = vmatpush3.bf16.msra.mxu0 %v5251_v17 }
 0x8e5   : > { %v1934_v19 = vadd.f32 %v5544_v33, %v4083_v38  ;;  %v1928_v42 = vpop.f32.mrb[79].mxu1  ;;  %4829 = vmatprep.subr.bf16.mxu0 %v5255_v25 }
 0x8e6   : > { %v1929_v13 = vadd.f32 %v5544_v33, %v1928_v42  ;;  %4134 = vmatprep.mubr.f32.mxu0 %v1949_v58  ;;  %v5754_v58 = vld [vmem:[#allocation8_spill] sm:$0xff]  ;;  %v5755_v42 = vld [vmem:[#allocation9_spill] sm:$0xff] }
 0x8e7   : > { %4135 = vmatmul.mubr.f32.gmra.mrb[92].mxu0 %v1950_v24  ;;  %v1952_v61 = vmax.f32 %v1934_v19, 0.0 }
 0x8e8   : > { %v1951_v29 = vmax.f32 %v1929_v13, 0.0  ;;  %4831 = vmatpush3.bf16.msra.mxu0 %v5255_v25 }
 0x8e9   : > { %4833 = vmatprep.subr.bf16.mxu0 %v5263_v35 }
 0x8ea   : > { %4137 = vmatprep.mubr.f32.mxu0 %v1951_v29 }
 0x8eb   : > { %4138 = vmatmul.mubr.f32.gmra.mrb[94].mxu0 %v1952_v61  ;;  %v4956_v61 = vld [vmem:[%s5699_s2 + $0x18] ss:$0 sm:$0xff] }
 0x8ec   : > { %4835 = vmatpush3.bf16.msra.mxu0 %v5263_v35 }
 0x8ed   : > { %4869 = vmatprep.subr.bf16.mxu0 %v5302_v44 }
 0x9a2   : > { %v4118_v17 = vpop.f32.mrb[80].mxu0 }
 0x9a3   : > { %v2025_v63 = vadd.f32 %v5581_v46, %v4118_v17  ;;  %v2019_v1 = vpop.f32.mrb[81].mxu0 }
 0x9a4   : > { %v2020_v25 = vadd.f32 %v5581_v46, %v2019_v1 }
 0x9a5   : > { %v2099_v50 = vmax.f32 %v2025_v63, 0.0 }
 0x9a6   : > { %v2098_v33 = vmax.f32 %v2020_v25, 0.0  ;;  %v4121_v22 = vpop.f32.mrb[82].mxu0 }
 0x9a7   : > { %v2035_v9 = vadd.f32 %v5581_v46, %v4121_v22  ;;  %v2029_v39 = vpop.f32.mrb[83].mxu0  ;;  %v5756_v22 = vld [vmem:[#allocation10_spill] sm:$0xff] }
 0x9a8   : > { %v2030_v35 = vadd.f32 %v5581_v46, %v2029_v39  ;;  %4172 = vmatprep.mubr.f32.mxu1 %v2098_v33 }
 0x9a9   : > { %4173 = vmatmul.mubr.f32.vlgmr.msra.gmra.mrb[80].mxu1 %v2099_v50  ;;  %v2101_v60 = vmax.f32 %v2035_v9, 0.0 }
 0x9aa   : > { %v2100_v47 = vmax.f32 %v2030_v35, 0.0  ;;  %v4124_v10 = vpop.f32.mrb[84].mxu0  ;;  %4839 = vmatpush3.bf16.msra.mxu1 %v5267_v41 }
 0x9ab   : > { %v2045_v8 = vadd.f32 %v5581_v46, %v4124_v10  ;;  %v2039_v48 = vpop.f32.mrb[85].mxu0  ;;  %4841 = vmatprep.subr.bf16.mxu1 %v5269_v43 }
 0x9ac   : > { %v2040_v20 = vadd.f32 %v5581_v46, %v2039_v48  ;;  %4175 = vmatprep.mubr.f32.mxu1 %v2100_v47  ;;  %v5757_v47 = vld [vmem:[#allocation11_spill] sm:$0xff]  ;;  %v5758_v48 = vld [vmem:[#allocation12_spill] sm:$0xff] }
 0x9ad   : > { %4176 = vmatmul.mubr.f32.gmra.mrb[82].mxu1 %v2101_v60  ;;  %v2103_v31 = vmax.f32 %v2045_v8, 0.0 }
 0x9ae   : > { %v2102_v14 = vmax.f32 %v2040_v20, 0.0  ;;  %v4127_v37 = vpop.f32.mrb[86].mxu0  ;;  %4843 = vmatpush3.bf16.msra.mxu1 %v5269_v43 }
 0x9af   : > { %v2055_v4 = vadd.f32 %v5581_v46, %v4127_v37  ;;  %v2049_v40 = vpop.f32.mrb[87].mxu0  ;;  %4845 = vmatprep.subr.bf16.mxu1 %v5274_v49 }
 0x9b0   : > { %v2050_v41 = vadd.f32 %v5581_v46, %v2049_v40  ;;  %4178 = vmatprep.mubr.f32.mxu1 %v2102_v14 }
 0x9b1   : > { %4179 = vmatmul.mubr.f32.gmra.mrb[84].mxu1 %v2103_v31  ;;  %v2105_v51 = vmax.f32 %v2055_v4, 0.0  ;;  %v5759_v4 = vld [vmem:[#allocation13_spill] sm:$0xff] }
 0x9b2   : > { %v2104_v3 = vmax.f32 %v2050_v41, 0.0  ;;  %v4130_v26 = vpop.f32.mrb[88].mxu0  ;;  %4847 = vmatpush3.bf16.msra.mxu1 %v5274_v49 }
 0x9b3   : > { %v2065_v7 = vadd.f32 %v5581_v46, %v4130_v26  ;;  %v2059_v12 = vpop.f32.mrb[89].mxu0  ;;  %4849 = vmatprep.subr.bf16.mxu1 %v5751_v53 }
 0x9b4   : > { %v2060_v43 = vadd.f32 %v5581_v46, %v2059_v12  ;;  %4181 = vmatprep.mubr.f32.mxu1 %v2104_v3 }
 0x9b5   : > { %4182 = vmatmul.mubr.f32.gmra.mrb[86].mxu1 %v2105_v51  ;;  %v2107_v11 = vmax.f32 %v2065_v7, 0.0  ;;  %v5760_v51 = vld [vmem:[#allocation14_spill] sm:$0xff] }
 0x9b6   : > { %v2106_v28 = vmax.f32 %v2060_v43, 0.0  ;;  %v4133_v34 = vpop.f32.mrb[90].mxu0  ;;  %4851 = vmatpush3.bf16.msra.mxu1 %v5751_v53 }
 0x9b7   : > { %v2075_v52 = vadd.f32 %v5581_v46, %v4133_v34  ;;  %v2069_v45 = vpop.f32.mrb[91].mxu0  ;;  %4853 = vmatprep.subr.bf16.mxu1 %v5752_v54 }
 0x9b8   : > { %v2070_v49 = vadd.f32 %v5581_v46, %v2069_v45  ;;  %4184 = vmatprep.mubr.f32.mxu1 %v2106_v28  ;;  %v5761_v28 = vld [vmem:[#allocation15_spill] sm:$0xff] }
 0x9b9   : > { %4185 = vmatmul.mubr.f32.gmra.mrb[88].mxu1 %v2107_v11  ;;  %v2109_v15 = vmax.f32 %v2075_v52, 0.0 }
 0x9ba   : > { %v2108_v56 = vmax.f32 %v2070_v49, 0.0  ;;  %v4136_v32 = vpop.f32.mrb[92].mxu0  ;;  %4855 = vmatpush3.bf16.msra.mxu1 %v5752_v54  ;;  %v5636_v49 = vld [vmem:[%s5699_s2 + $0x20] ss:$0 sm:$0xff] }
 0x9bb   : > { %v2085_v36 = vadd.f32 %v5581_v46, %v4136_v32  ;;  %v2079_v55 = vpop.f32.mrb[93].mxu0  ;;  %4857 = vmatprep.subr.bf16.mxu1 %v5753_v59 }
 0x9bc   : > { %v2080_v21 = vadd.f32 %v5581_v46, %v2079_v55  ;;  %4187 = vmatprep.mubr.f32.mxu1 %v2108_v56 }
 0x9bd   : > { %4188 = vmatmul.mubr.f32.gmra.mrb[90].mxu1 %v2109_v15  ;;  %v2111_v62 = vmax.f32 %v2085_v36, 0.0 }
 0x9be   : > { %v2110_v5 = vmax.f32 %v2080_v21, 0.0  ;;  %v4139_v18 = vpop.f32.mrb[94].mxu0  ;;  %4859 = vmatpush3.bf16.msra.mxu1 %v5753_v59 }
 0x9bf   : > { %v2095_v27 = vadd.f32 %v5581_v46, %v4139_v18  ;;  %v2089_v0 = vpop.f32.mrb[95].mxu0  ;;  %4861 = vmatprep.subr.bf16.mxu1 %v5754_v58 }
 0x9c0   : > { %v2090_v38 = vadd.f32 %v5581_v46, %v2089_v0  ;;  %4190 = vmatprep.mubr.f32.mxu1 %v2110_v5 }
 0x9c1   : > { %4191 = vmatmul.mubr.f32.gmra.mrb[92].mxu1 %v2111_v62  ;;  %v2113_v19 = vmax.f32 %v2095_v27, 0.0 }
 0x9c2   : > { %v2112_v24 = vmax.f32 %v2090_v38, 0.0  ;;  %4863 = vmatpush3.bf16.msra.mxu1 %v5754_v58 }
 0x9c3   : > { %4865 = vmatprep.subr.bf16.mxu1 %v5755_v42 }
 0x9c4   : > { %4193 = vmatprep.mubr.f32.mxu1 %v2112_v24 }
 0x9c5   : > { %4194 = vmatmul.mubr.f32.gmra.mrb[94].mxu1 %v2113_v19 }
 0x9c6   : > { %4867 = vmatpush3.bf16.msra.mxu1 %v5755_v42 }
 0x9c7   : > { %4901 = vmatprep.subr.bf16.mxu1 %v5338_v23 }
 0xa7c   : > { %v4174_v13 = vpop.f32.mrb[80].mxu1 }
 0xa7d   : > { %v2180_v29 = vpop.f32.mrb[81].mxu1  ;;  %v2186_v46 = vadd.f32 %v4956_v61, %v4174_v13 }
 0xa7e   : > { %v2181_v17 = vadd.f32 %v4956_v61, %v2180_v29 }
 0xa80   : > { %v4177_v63 = vpop.f32.mrb[82].mxu1  ;;  %4228 = vmatprep.mubr.f32.mxu0 %v2181_v17 }
 0xa81   : > { %v2190_v1 = vpop.f32.mrb[83].mxu1  ;;  %4229 = vmatmul.mubr.f32.vlgmr.msra.gmra.mrb[96].mxu0 %v2186_v46  ;;  %v2196_v33 = vadd.f32 %v4956_v61, %v4177_v63 }
 0xa82   : > { %v2191_v25 = vadd.f32 %v4956_v61, %v2190_v1  ;;  %4871 = vmatpush3.bf16.msra.mxu0 %v5302_v44 }
 0xa83   : > { %4873 = vmatprep.subr.bf16.mxu0 %v5756_v22 }
 0xa84   : > { %v4180_v50 = vpop.f32.mrb[84].mxu1  ;;  %4231 = vmatprep.mubr.f32.mxu0 %v2191_v25 }
 0xa85   : > { %v2200_v9 = vpop.f32.mrb[85].mxu1  ;;  %4232 = vmatmul.mubr.f32.gmra.mrb[98].mxu0 %v2196_v33  ;;  %v2206_v35 = vadd.f32 %v4956_v61, %v4180_v50 }
 0xa86   : > { %v2201_v39 = vadd.f32 %v4956_v61, %v2200_v9  ;;  %4875 = vmatpush3.bf16.msra.mxu0 %v5756_v22 }
 0xa87   : > { %4877 = vmatprep.subr.bf16.mxu0 %v5757_v47 }
 0xa88   : > { %v4183_v10 = vpop.f32.mrb[86].mxu1  ;;  %4234 = vmatprep.mubr.f32.mxu0 %v2201_v39  ;;  %v5762_v39 = vld [vmem:[#allocation16_spill] sm:$0xff] }
 0xa89   : > { %v2210_v60 = vpop.f32.mrb[87].mxu1  ;;  %4235 = vmatmul.mubr.f32.gmra.mrb[100].mxu0 %v2206_v35  ;;  %v2216_v44 = vadd.f32 %v4956_v61, %v4183_v10 }
 0xa8a   : > { %v2211_v8 = vadd.f32 %v4956_v61, %v2210_v60  ;;  %4879 = vmatpush3.bf16.msra.mxu0 %v5757_v47 }
 0xa8b   : > { %4881 = vmatprep.subr.bf16.mxu0 %v5758_v48 }
 0xa8c   : > { %v4186_v20 = vpop.f32.mrb[88].mxu1  ;;  %4237 = vmatprep.mubr.f32.mxu0 %v2211_v8 }
 0xa8d   : > { %v2220_v14 = vpop.f32.mrb[89].mxu1  ;;  %4238 = vmatmul.mubr.f32.gmra.mrb[102].mxu0 %v2216_v44  ;;  %v2226_v31 = vadd.f32 %v4956_v61, %v4186_v20  ;;  %v5763_v44 = vld [vmem:[#allocation17_spill] sm:$0xff] }
 0xa8e   : > { %v2221_v37 = vadd.f32 %v4956_v61, %v2220_v14  ;;  %4883 = vmatpush3.bf16.msra.mxu0 %v5758_v48 }
 0xa8f   : > { %4885 = vmatprep.subr.bf16.mxu0 %v5759_v4 }
 0xa90   : > { %v4189_v40 = vpop.f32.mrb[90].mxu1  ;;  %4240 = vmatprep.mubr.f32.mxu0 %v2221_v37 }
 0xa91   : > { %v2230_v41 = vpop.f32.mrb[91].mxu1  ;;  %4241 = vmatmul.mubr.f32.gmra.mrb[104].mxu0 %v2226_v31  ;;  %v2236_v26 = vadd.f32 %v4956_v61, %v4189_v40 }
 0xa92   : > { %v2231_v3 = vadd.f32 %v4956_v61, %v2230_v41  ;;  %4887 = vmatpush3.bf16.msra.mxu0 %v5759_v4  ;;  %v5764_v4 = vld [vmem:[#allocation18_spill] sm:$0xff] }
 0xa93   : > { %4889 = vmatprep.subr.bf16.mxu0 %v5760_v51 }
 0xa94   : > { %v4192_v7 = vpop.f32.mrb[92].mxu1  ;;  %4243 = vmatprep.mubr.f32.mxu0 %v2231_v3 }
 0xa95   : > { %v2240_v12 = vpop.f32.mrb[93].mxu1  ;;  %4244 = vmatmul.mubr.f32.gmra.mrb[106].mxu0 %v2236_v26  ;;  %v2246_v43 = vadd.f32 %v4956_v61, %v4192_v7 }
 0xa96   : > { %v2241_v53 = vadd.f32 %v4956_v61, %v2240_v12  ;;  %4891 = vmatpush3.bf16.msra.mxu0 %v5760_v51  ;;  %v4958_v51 = vld [vmem:[%s5699_s2 + $0x28] ss:$0 sm:$0xff] }
 0xa97   : > { %4893 = vmatprep.subr.bf16.mxu0 %v5761_v28 }
 0xa98   : > { %v4195_v34 = vpop.f32.mrb[94].mxu1  ;;  %4246 = vmatprep.mubr.f32.mxu0 %v2241_v53 }
 0xa99   : > { %v2250_v11 = vpop.f32.mrb[95].mxu1  ;;  %4247 = vmatmul.mubr.f32.gmra.mrb[108].mxu0 %v2246_v43  ;;  %v2256_v45 = vadd.f32 %v4956_v61, %v4195_v34 }
 0xa9a   : > { %v2251_v52 = vadd.f32 %v4956_v61, %v2250_v11  ;;  %4895 = vmatpush3.bf16.msra.mxu0 %v5761_v28 }
 0xa9b   : > { %4897 = vmatprep.subr.bf16.mxu0 %v5333_v30 }
 0xa9c   : > { %4249 = vmatprep.mubr.f32.mxu0 %v2251_v52 }
 0xa9d   : > { %4250 = vmatmul.mubr.f32.gmra.mrb[110].mxu0 %v2256_v45 }
 0xa9e   : > { %4899 = vmatpush3.bf16.msra.mxu0 %v5333_v30 }
 0xb54   : > { %v4230_v54 = vpop.f32.mrb[96].mxu0 }
 0xb55   : > { %v2331_v56 = vadd.f32 %v5636_v49, %v4230_v54  ;;  %v2325_v32 = vpop.f32.mrb[97].mxu0 }
 0xb56   : > { %v2326_v15 = vadd.f32 %v5636_v49, %v2325_v32 }
 0xb57   : > { %v2405_v59 = vmax.f32 %v2331_v56, 0.0 }
 0xb58   : > { %v2404_v36 = vmax.f32 %v2326_v15, 0.0  ;;  %v4233_v55 = vpop.f32.mrb[98].mxu0 }
 0xb59   : > { %v2341_v21 = vadd.f32 %v5636_v49, %v4233_v55  ;;  %v2335_v5 = vpop.f32.mrb[99].mxu0 }
 0xb5a   : > { %v2336_v18 = vadd.f32 %v5636_v49, %v2335_v5  ;;  %4284 = vmatprep.mubr.f32.mxu1 %v2404_v36 }
 0xb5b   : > { %4285 = vmatmul.mubr.f32.vlgmr.msra.gmra.mrb[96].mxu1 %v2405_v59  ;;  %v2407_v27 = vmax.f32 %v2341_v21, 0.0 }
 0xb5c   : > { %v2406_v30 = vmax.f32 %v2336_v18, 0.0  ;;  %v4236_v62 = vpop.f32.mrb[100].mxu0  ;;  %4903 = vmatpush3.bf16.msra.mxu1 %v5338_v23 }
 0xb5d   : > { %v2351_v0 = vadd.f32 %v5636_v49, %v4236_v62  ;;  %v2345_v58 = vpop.f32.mrb[101].mxu0  ;;  %4905 = vmatprep.subr.bf16.mxu1 %v5340_v6 }
 0xb5e   : > { %v2346_v38 = vadd.f32 %v5636_v49, %v2345_v58  ;;  %4287 = vmatprep.mubr.f32.mxu1 %v2406_v30 }
 0xb5f   : > { %4288 = vmatmul.mubr.f32.gmra.mrb[98].mxu1 %v2407_v27  ;;  %v2409_v42 = vmax.f32 %v2351_v0, 0.0 }
 0xb60   : > { %v2408_v24 = vmax.f32 %v2346_v38, 0.0  ;;  %v4239_v19 = vpop.f32.mrb[102].mxu0  ;;  %4907 = vmatpush3.bf16.msra.mxu1 %v5340_v6 }
 0xb61   : > { %v2361_v13 = vadd.f32 %v5636_v49, %v4239_v19  ;;  %v2355_v29 = vpop.f32.mrb[103].mxu0  ;;  %4909 = vmatprep.subr.bf16.mxu1 %v5345_v16 }
 0xb62   : > { %v2356_v23 = vadd.f32 %v5636_v49, %v2355_v29  ;;  %4290 = vmatprep.mubr.f32.mxu1 %v2408_v24 }
 0xb63   : > { %4291 = vmatmul.mubr.f32.gmra.mrb[100].mxu1 %v2409_v42  ;;  %v2411_v46 = vmax.f32 %v2361_v13, 0.0 }
 0xb64   : > { %v2410_v61 = vmax.f32 %v2356_v23, 0.0  ;;  %v4242_v17 = vpop.f32.mrb[104].mxu0  ;;  %4911 = vmatpush3.bf16.msra.mxu1 %v5345_v16 }
 0xb65   : > { %v2371_v63 = vadd.f32 %v5636_v49, %v4242_v17  ;;  %v2365_v1 = vpop.f32.mrb[105].mxu0  ;;  %4913 = vmatprep.subr.bf16.mxu1 %v5349_v2 }
 0xb66   : > { %v2366_v6 = vadd.f32 %v5636_v49, %v2365_v1  ;;  %4293 = vmatprep.mubr.f32.mxu1 %v2410_v61 }
 0xb67   : > { %4294 = vmatmul.mubr.f32.gmra.mrb[102].mxu1 %v2411_v46  ;;  %v2413_v22 = vmax.f32 %v2371_v63, 0.0 }
 0xb68   : > { %v2412_v25 = vmax.f32 %v2366_v6, 0.0  ;;  %v4245_v33 = vpop.f32.mrb[106].mxu0  ;;  %4915 = vmatpush3.bf16.msra.mxu1 %v5349_v2 }
 0xb69   : > { %v2381_v50 = vadd.f32 %v5636_v49, %v4245_v33  ;;  %v2375_v9 = vpop.f32.mrb[107].mxu0  ;;  %4917 = vmatprep.subr.bf16.mxu1 %v5762_v39 }
 0xb6a   : > { %v2376_v16 = vadd.f32 %v5636_v49, %v2375_v9  ;;  %4296 = vmatprep.mubr.f32.mxu1 %v2412_v25 }
 0xb6b   : > { %4297 = vmatmul.mubr.f32.gmra.mrb[104].mxu1 %v2413_v22  ;;  %v2415_v10 = vmax.f32 %v2381_v50, 0.0 }
 0xb6c   : > { %v2414_v35 = vmax.f32 %v2376_v16, 0.0  ;;  %v4248_v47 = vpop.f32.mrb[108].mxu0  ;;  %4919 = vmatpush3.bf16.msra.mxu1 %v5762_v39 }
 0xb6d   : > { %v2391_v60 = vadd.f32 %v5636_v49, %v4248_v47  ;;  %v2385_v8 = vpop.f32.mrb[109].mxu0  ;;  %4921 = vmatprep.subr.bf16.mxu1 %v5763_v44 }
 0xb6e   : > { %v2386_v2 = vadd.f32 %v5636_v49, %v2385_v8  ;;  %4299 = vmatprep.mubr.f32.mxu1 %v2414_v35 }
 0xb6f   : > { %4300 = vmatmul.mubr.f32.gmra.mrb[106].mxu1 %v2415_v10  ;;  %v2417_v14 = vmax.f32 %v2391_v60, 0.0  ;;  %v4959_v10 = vld [vmem:[%s5699_s2 + $0x30] ss:$0 sm:$0xff] }
 0xb70   : > { %v2416_v48 = vmax.f32 %v2386_v2, 0.0  ;;  %v4251_v20 = vpop.f32.mrb[110].mxu0  ;;  %4923 = vmatpush3.bf16.msra.mxu1 %v5763_v44 }
 0xb71   : > { %v2401_v37 = vadd.f32 %v5636_v49, %v4251_v20  ;;  %v2395_v31 = vpop.f32.mrb[111].mxu0  ;;  %4925 = vmatprep.subr.bf16.mxu1 %v5764_v4 }
 0xb72   : > { %v2396_v40 = vadd.f32 %v5636_v49, %v2395_v31  ;;  %4302 = vmatprep.mubr.f32.mxu1 %v2416_v48 }
 0xb73   : > { %4303 = vmatmul.mubr.f32.gmra.mrb[108].mxu1 %v2417_v14  ;;  %v2419_v3 = vmax.f32 %v2401_v37, 0.0 }
 0xb74   : > { %v2418_v41 = vmax.f32 %v2396_v40, 0.0  ;;  %4927 = vmatpush3.bf16.msra.mxu1 %v5764_v4 }
 0xb75   : > { %4929 = vmatprep.subr.bf16.mxu1 %v5403_v57 }
 0xb76   : > { %4305 = vmatprep.mubr.f32.mxu1 %v2418_v41 }
 0xb77   : > { %4306 = vmatmul.mubr.f32.gmra.mrb[110].mxu1 %v2419_v3 }
 0xb78   : > { %4931 = vmatpush3.bf16.msra.mxu1 %v5403_v57 }
 0xc2e   : > { %v4286_v26 = vpop.f32.mrb[96].mxu1 }
 0xc2f   : > { %v2492_v7 = vadd.f32 %v4958_v51, %v4286_v26  ;;  %v2486_v12 = vpop.f32.mrb[97].mxu1 }
 0xc30   : > { %v2487_v53 = vadd.f32 %v4958_v51, %v2486_v12 }
 0xc31   : > { %v2566_v34 = vmax.f32 %v2492_v7, 0.0 }
 0xc32   : > { %v2565_v43 = vmax.f32 %v2487_v53, 0.0  ;;  %v4289_v28 = vpop.f32.mrb[98].mxu1 }
 0xc33   : > { %v2502_v11 = vadd.f32 %v4958_v51, %v4289_v28  ;;  %v2496_v52 = vpop.f32.mrb[99].mxu1 }
 0xc34   : > { %v2497_v45 = vadd.f32 %v4958_v51, %v2496_v52  ;;  %4340 = vmatprep.mubr.f32.mxu0 %v2565_v43 }
 0xc35   : > { %4341 = vmatmul.mubr.f32.vlgmr.msra.gmra.mrb[112].mxu0 %v2566_v34  ;;  %v2568_v56 = vmax.f32 %v2502_v11, 0.0 }
 0xc36   : > { %v2567_v54 = vmax.f32 %v2497_v45, 0.0  ;;  %v4292_v49 = vpop.f32.mrb[100].mxu1 }
 0xc37   : > { %v2512_v57 = vadd.f32 %v4958_v51, %v4292_v49  ;;  %v2506_v32 = vpop.f32.mrb[101].mxu1 }
 0xc38   : > { %v2507_v15 = vadd.f32 %v4958_v51, %v2506_v32  ;;  %4343 = vmatprep.mubr.f32.mxu0 %v2567_v54 }
 0xc39   : > { %4344 = vmatmul.mubr.f32.gmra.mrb[114].mxu0 %v2568_v56  ;;  %v2570_v59 = vmax.f32 %v2512_v57, 0.0 }
 0xc3a   : > { %v2569_v36 = vmax.f32 %v2507_v15, 0.0  ;;  %v4295_v55 = vpop.f32.mrb[102].mxu1 }
 0xc3b   : > { %v2522_v21 = vadd.f32 %v4958_v51, %v4295_v55  ;;  %v2516_v5 = vpop.f32.mrb[103].mxu1 }
 0xc3c   : > { %v2517_v18 = vadd.f32 %v4958_v51, %v2516_v5  ;;  %4346 = vmatprep.mubr.f32.mxu0 %v2569_v36 }
 0xc3d   : > { %4347 = vmatmul.mubr.f32.gmra.mrb[116].mxu0 %v2570_v59  ;;  %v2572_v27 = vmax.f32 %v2522_v21, 0.0 }
 0xc3e   : > { %v2571_v30 = vmax.f32 %v2517_v18, 0.0  ;;  %v4298_v62 = vpop.f32.mrb[104].mxu1 }
 0xc3f   : > { %v2532_v0 = vadd.f32 %v4958_v51, %v4298_v62  ;;  %v2526_v58 = vpop.f32.mrb[105].mxu1 }
 0xc40   : > { %v2527_v38 = vadd.f32 %v4958_v51, %v2526_v58  ;;  %4349 = vmatprep.mubr.f32.mxu0 %v2571_v30 }
 0xc41   : > { %4350 = vmatmul.mubr.f32.gmra.mrb[118].mxu0 %v2572_v27  ;;  %v2574_v42 = vmax.f32 %v2532_v0, 0.0 }
 0xc42   : > { %v2573_v24 = vmax.f32 %v2527_v38, 0.0  ;;  %v4301_v19 = vpop.f32.mrb[106].mxu1 }
 0xc43   : > { %v2542_v13 = vadd.f32 %v4958_v51, %v4301_v19  ;;  %v2536_v29 = vpop.f32.mrb[107].mxu1 }
 0xc44   : > { %v2537_v23 = vadd.f32 %v4958_v51, %v2536_v29  ;;  %4352 = vmatprep.mubr.f32.mxu0 %v2573_v24 }
 0xc45   : > { %4353 = vmatmul.mubr.f32.gmra.mrb[120].mxu0 %v2574_v42  ;;  %v2576_v46 = vmax.f32 %v2542_v13, 0.0 }
 0xc46   : > { %v2575_v61 = vmax.f32 %v2537_v23, 0.0  ;;  %v4304_v17 = vpop.f32.mrb[108].mxu1 }
 0xc47   : > { %v2552_v63 = vadd.f32 %v4958_v51, %v4304_v17  ;;  %v2546_v1 = vpop.f32.mrb[109].mxu1 }
 0xc48   : > { %v2547_v6 = vadd.f32 %v4958_v51, %v2546_v1  ;;  %4355 = vmatprep.mubr.f32.mxu0 %v2575_v61  ;;  %v4960_v61 = vld [vmem:[%s5699_s2 + $0x38] ss:$0 sm:$0xff] }
 0xc49   : > { %4356 = vmatmul.mubr.f32.gmra.mrb[122].mxu0 %v2576_v46  ;;  %v2578_v22 = vmax.f32 %v2552_v63, 0.0 }
 0xc4a   : > { %v2577_v25 = vmax.f32 %v2547_v6, 0.0  ;;  %v4307_v33 = vpop.f32.mrb[110].mxu1 }
 0xc4b   : > { %v2562_v50 = vadd.f32 %v4958_v51, %v4307_v33  ;;  %v2556_v9 = vpop.f32.mrb[111].mxu1 }
 0xc4c   : > { %v2557_v39 = vadd.f32 %v4958_v51, %v2556_v9  ;;  %4358 = vmatprep.mubr.f32.mxu0 %v2577_v25 }
 0xc4d   : > { %4359 = vmatmul.mubr.f32.gmra.mrb[124].mxu0 %v2578_v22  ;;  %v2580_v35 = vmax.f32 %v2562_v50, 0.0 }
 0xc4e   : > { %v2579_v16 = vmax.f32 %v2557_v39, 0.0 }
 0xc50   : > { %4361 = vmatprep.mubr.f32.mxu0 %v2579_v16 }
 0xc51   : > { %4362 = vmatmul.mubr.f32.gmra.mrb[126].mxu0 %v2580_v35 }
 0xd08   : > { %v4342_v47 = vpop.f32.mrb[112].mxu0 }
 0xd09   : > { %v2653_v60 = vadd.f32 %v4959_v10, %v4342_v47  ;;  %v2647_v8 = vpop.f32.mrb[113].mxu0 }
 0xd0a   : > { %v2648_v44 = vadd.f32 %v4959_v10, %v2647_v8 }
 0xd0b   : > { %v2727_v20 = vmax.f32 %v2653_v60, 0.0 }
 0xd0c   : > { %v2726_v2 = vmax.f32 %v2648_v44, 0.0  ;;  %v4345_v48 = vpop.f32.mrb[114].mxu0 }
 0xd0d   : > { %v2663_v14 = vadd.f32 %v4959_v10, %v4345_v48  ;;  %v2657_v37 = vpop.f32.mrb[115].mxu0 }
 0xd0e   : > { %v2658_v31 = vadd.f32 %v4959_v10, %v2657_v37  ;;  %4396 = vmatprep.mubr.f32.mxu1 %v2726_v2 }
 0xd0f   : > { %4397 = vmatmul.mubr.f32.vlgmr.msra.gmra.mrb[112].mxu1 %v2727_v20  ;;  %v2729_v41 = vmax.f32 %v2663_v14, 0.0 }
 0xd10   : > { %v2728_v4 = vmax.f32 %v2658_v31, 0.0  ;;  %v4348_v40 = vpop.f32.mrb[116].mxu0 }
 0xd11   : > { %v2673_v3 = vadd.f32 %v4959_v10, %v4348_v40  ;;  %v2667_v26 = vpop.f32.mrb[117].mxu0 }
 0xd12   : > { %v2668_v51 = vadd.f32 %v4959_v10, %v2667_v26  ;;  %4399 = vmatprep.mubr.f32.mxu1 %v2728_v4 }
 0xd13   : > { %4400 = vmatmul.mubr.f32.gmra.mrb[114].mxu1 %v2729_v41  ;;  %v2731_v53 = vmax.f32 %v2673_v3, 0.0 }
 0xd14   : > { %v2730_v7 = vmax.f32 %v2668_v51, 0.0  ;;  %v4351_v12 = vpop.f32.mrb[118].mxu0 }
 0xd15   : > { %v2683_v43 = vadd.f32 %v4959_v10, %v4351_v12  ;;  %v2677_v28 = vpop.f32.mrb[119].mxu0 }
 0xd16   : > { %v2678_v34 = vadd.f32 %v4959_v10, %v2677_v28  ;;  %4402 = vmatprep.mubr.f32.mxu1 %v2730_v7 }
 0xd17   : > { %4403 = vmatmul.mubr.f32.gmra.mrb[116].mxu1 %v2731_v53  ;;  %v2733_v45 = vmax.f32 %v2683_v43, 0.0 }
 0xd18   : > { %v2732_v11 = vmax.f32 %v2678_v34, 0.0  ;;  %v4354_v52 = vpop.f32.mrb[120].mxu0 }
 0xd19   : > { %v2693_v54 = vadd.f32 %v4959_v10, %v4354_v52  ;;  %v2687_v49 = vpop.f32.mrb[121].mxu0 }
 0xd1a   : > { %v2688_v56 = vadd.f32 %v4959_v10, %v2687_v49  ;;  %4405 = vmatprep.mubr.f32.mxu1 %v2732_v11 }
 0xd1b   : > { %4406 = vmatmul.mubr.f32.gmra.mrb[118].mxu1 %v2733_v45  ;;  %v2735_v15 = vmax.f32 %v2693_v54, 0.0 }
 0xd1c   : > { %v2734_v57 = vmax.f32 %v2688_v56, 0.0  ;;  %v4357_v32 = vpop.f32.mrb[122].mxu0 }
 0xd1d   : > { %v2703_v36 = vadd.f32 %v4959_v10, %v4357_v32  ;;  %v2697_v55 = vpop.f32.mrb[123].mxu0 }
 0xd1e   : > { %v2698_v59 = vadd.f32 %v4959_v10, %v2697_v55  ;;  %4408 = vmatprep.mubr.f32.mxu1 %v2734_v57 }
 0xd1f   : > { %4409 = vmatmul.mubr.f32.gmra.mrb[120].mxu1 %v2735_v15  ;;  %v2737_v18 = vmax.f32 %v2703_v36, 0.0 }
 0xd20   : > { %v2736_v21 = vmax.f32 %v2698_v59, 0.0  ;;  %v4360_v5 = vpop.f32.mrb[124].mxu0 }
 0xd21   : > { %v2713_v30 = vadd.f32 %v4959_v10, %v4360_v5  ;;  %v2707_v62 = vpop.f32.mrb[125].mxu0 }
 0xd22   : > { %v2708_v27 = vadd.f32 %v4959_v10, %v2707_v62  ;;  %4411 = vmatprep.mubr.f32.mxu1 %v2736_v21 }
 0xd23   : > { %4412 = vmatmul.mubr.f32.gmra.mrb[122].mxu1 %v2737_v18  ;;  %v2739_v38 = vmax.f32 %v2713_v30, 0.0 }
 0xd24   : > { %v2738_v0 = vmax.f32 %v2708_v27, 0.0  ;;  %v4363_v58 = vpop.f32.mrb[126].mxu0 }
 0xd25   : > { %v2723_v24 = vadd.f32 %v4959_v10, %v4363_v58  ;;  %v2717_v19 = vpop.f32.mrb[127].mxu0 }
 0xd26   : > { %v2718_v42 = vadd.f32 %v4959_v10, %v2717_v19  ;;  %4414 = vmatprep.mubr.f32.mxu1 %v2738_v0 }
 0xd27   : > { %4415 = vmatmul.mubr.f32.gmra.mrb[124].mxu1 %v2739_v38  ;;  %v2741_v29 = vmax.f32 %v2723_v24, 0.0 }
 0xd28   : > { %v2740_v13 = vmax.f32 %v2718_v42, 0.0 }
 0xd2a   : > { %4417 = vmatprep.mubr.f32.mxu1 %v2740_v13 }
 0xd2b   : > { %4418 = vmatmul.mubr.f32.gmra.mrb[126].mxu1 %v2741_v29 }
 0xde2   : > { %v4398_v23 = vpop.f32.mrb[112].mxu1 }
 0xde3   : > { %v2814_v17 = vadd.f32 %v4960_v61, %v4398_v23  ;;  %v2808_v46 = vpop.f32.mrb[113].mxu1 }
 0xde4   : > { %v2809_v63 = vadd.f32 %v4960_v61, %v2808_v46 }
 0xde5   : > { %2904 = vst [vmem:[%s5454_s29 + $0x18] sm:$0xff] %v2814_v17 }
 0xde6   : > { %2903 = vst [vmem:[%s5454_s29 + $0x8] sm:$0xff] %v2809_v63  ;;  %v4401_v1 = vpop.f32.mrb[114].mxu1 }
 0xde7   : > { %v2824_v6 = vadd.f32 %v4960_v61, %v4401_v1  ;;  %v2818_v25 = vpop.f32.mrb[115].mxu1 }
 0xde8   : > { %v2819_v33 = vadd.f32 %v4960_v61, %v2818_v25 }
 0xde9   : > { %2906 = vst [vmem:[%s5454_s29 + $0x38] sm:$0xff] %v2824_v6 }
 0xdea   : > { %2905 = vst [vmem:[%s5454_s29 + $0x28] sm:$0xff] %v2819_v33  ;;  %v4404_v22 = vpop.f32.mrb[116].mxu1 }
 0xdeb   : > { %v2834_v50 = vadd.f32 %v4960_v61, %v4404_v22  ;;  %v2828_v9 = vpop.f32.mrb[117].mxu1 }
 0xdec   : > { %v2829_v39 = vadd.f32 %v4960_v61, %v2828_v9 }
 0xded   : > { %2908 = vst [vmem:[%s5454_s29 + $0x58] sm:$0xff] %v2834_v50 }
 0xdee   : > { %2907 = vst [vmem:[%s5454_s29 + $0x48] sm:$0xff] %v2829_v39  ;;  %v4407_v16 = vpop.f32.mrb[118].mxu1 }
 0xdef   : > { %v2844_v35 = vadd.f32 %v4960_v61, %v4407_v16  ;;  %v2838_v47 = vpop.f32.mrb[119].mxu1 }
 0xdf0   : > { %v2839_v10 = vadd.f32 %v4960_v61, %v2838_v47 }
 0xdf1   : > { %2910 = vst [vmem:[%s5454_s29 + $0x78] sm:$0xff] %v2844_v35 }
 0xdf2   : > { %2909 = vst [vmem:[%s5454_s29 + $0x68] sm:$0xff] %v2839_v10  ;;  %v4410_v60 = vpop.f32.mrb[120].mxu1 }
 0xdf3   : > { %v2854_v8 = vadd.f32 %v4960_v61, %v4410_v60  ;;  %v2848_v44 = vpop.f32.mrb[121].mxu1 }
 0xdf4   : > { %v2849_v2 = vadd.f32 %v4960_v61, %v2848_v44 }
 0xdf5   : > { %2912 = vst [vmem:[%s5454_s29 + $0x98] sm:$0xff] %v2854_v8 }
 0xdf6   : > { %2911 = vst [vmem:[%s5454_s29 + $0x88] sm:$0xff] %v2849_v2  ;;  %v4413_v48 = vpop.f32.mrb[122].mxu1 }
 0xdf7   : > { %v2864_v20 = vadd.f32 %v4960_v61, %v4413_v48  ;;  %v2858_v14 = vpop.f32.mrb[123].mxu1 }
 0xdf8   : > { %v2859_v37 = vadd.f32 %v4960_v61, %v2858_v14 }
 0xdf9   : > { %2914 = vst [vmem:[%s5454_s29 + $0xb8] sm:$0xff] %v2864_v20 }
 0xdfa   : > { %2913 = vst [vmem:[%s5454_s29 + $0xa8] sm:$0xff] %v2859_v37  ;;  %v4416_v31 = vpop.f32.mrb[124].mxu1 }
 0xdfb   : > { %v2874_v4 = vadd.f32 %v4960_v61, %v4416_v31  ;;  %v2868_v40 = vpop.f32.mrb[125].mxu1 }
 0xdfc   : > { %v2869_v41 = vadd.f32 %v4960_v61, %v2868_v40 }
 0xdfd   : > { %2916 = vst [vmem:[%s5454_s29 + $0xd8] sm:$0xff] %v2874_v4 }
 0xdfe   : > { %2915 = vst [vmem:[%s5454_s29 + $0xc8] sm:$0xff] %v2869_v41  ;;  %v4419_v3 = vpop.f32.mrb[126].mxu1 }
 0xdff   : > { %v2884_v26 = vadd.f32 %v4960_v61, %v4419_v3  ;;  %v2878_v51 = vpop.f32.mrb[127].mxu1 }
 0xe00   : > { %v2879_v7 = vadd.f32 %v4960_v61, %v2878_v51 }
 0xe01   : > { %2918 = vst [vmem:[%s5454_s29 + $0xf8] sm:$0xff] %v2884_v26 }
 0xe02   : > { %2917 = vst [vmem:[%s5454_s29 + $0xe8] sm:$0xff] %v2879_v7 }
 0xe03 PF: > { %s14_s12 = sadd.s32 1, %s4999_s12  }
 0xe04   : > { %p11_p3 = scmp.ge.s32.totalorder %s14_s12, 4  }
 0xe06   :  { %13 = sbr.rel (!%p11_p3) target bundleno = 1 (0x1), region = 67 }
 0xe0d   :  { %2943 = vsyncpa [#allocation3], 1 }
 0xe0e   :  { %2945 = vsyncpa [#allocation3 + $0x1], 1 }

</bundles_post_ra>
